<compile_context>
chip_gen: v7x
topology: tpu7x:2x2x1
jax: 0.10.0
libtpu: 0.0.40
codegen_flags: <defaults>
</compile_context>

<pallas_src>
import functools

import jax
import jax.numpy as jnp
from jax import lax
from jax.experimental import pallas as pl
from jax.experimental.pallas import tpu as pltpu

VMEM_SPEC = pl.BlockSpec(memory_space=pltpu.MemorySpace.VMEM)
LN_EPS = 1e-5  # torch.nn.LayerNorm default


def _layer_norm_affine(y, g, b, eps):
    mu = jnp.mean(y, axis=-1, keepdims=True)
    var = jnp.mean(jnp.square(y - mu), axis=-1, keepdims=True)
    y = (y - mu) * lax.rsqrt(var + eps)
    return y * g + b


# --------------------------------------------------------------------------
# Fused decoder kernel
# --------------------------------------------------------------------------
def _decoder_kernel(*refs, num_layers, token_len, batch, hidden):
    """Fused RNNHyperTokenDecoder forward.

    ref layout (all bf16, whole-array VMEM blocks):
      [0]              z        [B, Hs]
      [1:5]            expand   w_e [Hs, H], b_e [1, H], g_e [1, H], beta_e [1, H]
      [5]              pos      [T, H]
      [6 : 6+3L]       per RNN layer: wih_cat [I_l, 2H], whh_blockdiag [2H, 2H],
                       bias_cat [1, 2H]   (fwd | bwd fused on lanes)
      [6+3L : 6+3L+6]  project  w1 [2H, E], b1 [1, E], g1 [1, E], beta1 [1, E],
                       w2_pad [E, Vpad], b2_pad [1, Vpad]
      [-1]             out      [T*B, Vpad]   (row = t*B + b)
    """
    T, B, H = token_len, batch, hidden
    f32 = jnp.float32

    z_ref, we_ref, be_ref, ge_ref, bte_ref, pos_ref = refs[:6]
    rnn_refs = refs[6:6 + 3 * num_layers]
    (w1_ref, b1_ref, g1_ref, bt1_ref, w2_ref, b2_ref) = refs[
        6 + 3 * num_layers: 6 + 3 * num_layers + 6]
    out_ref = refs[-1]

    # ---- expand head: ReLU(LayerNorm(z @ We + be)) -------------------------
    y = (jnp.dot(z_ref[...], we_ref[...], preferred_element_type=f32)
         + be_ref[...].astype(f32))
    y = _layer_norm_affine(y, ge_ref[...].astype(f32),
                           bte_ref[...].astype(f32), LN_EPS)
    expanded = jnp.maximum(y, 0.0).astype(jnp.bfloat16)           # [B, H]
    # TODO(synk): nn.Dropout after expand is training-only; identity in eval.

    # ---- layer-0 sequence input: row (t*B + b) = expanded[b] + pos[t] ------
    pos = pos_ref[...]                                            # [T, H]
    layer_in = jnp.concatenate(
        [expanded + pos[t:t + 1, :] for t in range(T)], axis=0)   # [T*B, H]

    # initial hidden: same `expanded` for every layer and both directions
    # (matches h0 = expanded.unsqueeze(0).repeat(num_layers*2, 1, 1))
    h0_both = jnp.concatenate([expanded, expanded], axis=1)       # [B, 2H]

    # ---- bidirectional relu-RNN stack (fwd/bwd fused per layer) ------------
    for l in range(num_layers):
        wih = rnn_refs[3 * l][...]          # [I_l, 2H]   (fwd | bwd)
        whh = rnn_refs[3 * l + 1][...]      # [2H, 2H]    block-diagonal
        bias = rnn_refs[3 * l + 2][...]     # [1, 2H]     (b_ih + b_hh, fwd|bwd)

        # Input projection for all timesteps & both directions in ONE matmul,
        # hoisted off the serial recurrence.
        xp = (jnp.dot(layer_in, wih, preferred_element_type=f32)
              + bias.astype(f32))           # [T*B, 2H] f32

        h_both = h0_both
        h_fwd = [None] * T
        h_bwd = [None] * T
        for s in range(T):                  # fully unrolled (T static)
            tf = s
            tb = T - 1 - s
            inp = jnp.concatenate(
                [xp[tf * B:(tf + 1) * B, :H],       # fwd input pre-act @ t=tf
                 xp[tb * B:(tb + 1) * B, H:]],      # bwd input pre-act @ t=tb
                axis=1)                             # [B, 2H]
            pre = inp + jnp.dot(h_both, whh, preferred_element_type=f32)
            h_both = jnp.maximum(pre, 0.0).astype(jnp.bfloat16)   # relu cell
            h_fwd[tf] = h_both[:, :H]
            h_bwd[tb] = h_both[:, H:]

        layer_in = jnp.concatenate(
            [jnp.concatenate([h_fwd[t], h_bwd[t]], axis=1) for t in range(T)],
            axis=0)                                               # [T*B, 2H]
        # TODO(synk): inter-layer RNN dropout is training-only; identity here.

    # ---- projection head ----------------------------------------------------
    y = (jnp.dot(layer_in, w1_ref[...], preferred_element_type=f32)
         + b1_ref[...].astype(f32))                               # [T*B, E]
    y = _layer_norm_affine(y, g1_ref[...].astype(f32),
                           bt1_ref[...].astype(f32), LN_EPS)
    h_proj = jnp.maximum(y, 0.0).astype(jnp.bfloat16)

    logits = (jnp.dot(h_proj, w2_ref[...], preferred_element_type=f32)
              + b2_ref[...].astype(f32))                          # [T*B, Vpad]
    out_ref[...] = logits.astype(out_ref.dtype)                   # lane-dense


# --------------------------------------------------------------------------
# Wrapper
# --------------------------------------------------------------------------
def decoder_forward(params, z, *, token_len, num_layers, vocab_size):
    B = z.shape[0]
    H = params['pos'].shape[1]            # RNN hidden size (= 2 * embed_dim)
    Vpad = params['w2p'].shape[1]
    T = token_len

    inputs = [z,
              params['we'], params['be'], params['ge'], params['bte'],
              params['pos']]
    for layer in params['rnn']:
        inputs.extend(layer)              # (wih_cat, whh_blockdiag, bias_cat)
    inputs.extend([params['w1'], params['b1'], params['g1'], params['bt1'],
                   params['w2p'], params['b2p']])

    kernel = functools.partial(_decoder_kernel, num_layers=num_layers,
                               token_len=T, batch=B, hidden=H)
    out = pl.pallas_call(
        kernel,
        out_shape=jax.ShapeDtypeStruct((T * B, Vpad), jnp.bfloat16),
        in_specs=[VMEM_SPEC] * len(inputs),
        out_specs=VMEM_SPEC,
    )(*inputs)

    # rows are ordered t*B + b -> batch-first; drop vocab padding.
    logits = out.reshape(T, B, Vpad).transpose(1, 0, 2)[:, :, :vocab_size]
    return logits


# --------------------------------------------------------------------------
# Deterministic parameter init (shapes follow the nn.Module __init__);
# weights are pre-fused into the kernel-friendly layouts at init time.
# --------------------------------------------------------------------------
def _round_up(x, m):
    return ((x + m - 1) // m) * m


def _rnd(key, shape, scale=0.1):
    return (jax.random.normal(key, shape, jnp.float32) * scale).astype(jnp.bfloat16)


def init_params(key, vocab_size, token_len, embed_dim, hypertoken_size,
                num_layers):
    E, Hs = embed_dim, hypertoken_size
    H = 2 * E                                     # RNN hidden size
    Vpad = _round_up(vocab_size, 128)
    p = {}

    # expand: Linear(Hs, 2E) + LayerNorm(2E)
    key, k1, k2 = jax.random.split(key, 3)
    p['we'] = _rnd(k1, (Hs, H))                   # torch weight^T
    p['be'] = _rnd(k2, (1, H))
    p['ge'] = jnp.ones((1, H), jnp.bfloat16)
    p['bte'] = jnp.zeros((1, H), jnp.bfloat16)

    # positional embedding table
    key, k1 = jax.random.split(key)
    p['pos'] = _rnd(k1, (token_len, H))

    # bidirectional relu-RNN: per layer fuse fwd/bwd weights
    layers = []
    for l in range(num_layers):
        in_l = H if l == 0 else 2 * H
        per_dir = []
        for _d in range(2):                       # fwd, bwd
            key, k1, k2, k3, k4 = jax.random.split(key, 5)
            wih = _rnd(k1, (in_l, H))             # torch weight_ih^T
            whh = _rnd(k2, (H, H))                # torch weight_hh^T
            b = (_rnd(k3, (1, H)).astype(jnp.float32)
                 + _rnd(k4, (1, H)).astype(jnp.float32)
                 ).astype(jnp.bfloat16)           # b_ih + b_hh
            per_dir.append((wih, whh, b))
        (wih_f, whh_f, b_f), (wih_b, whh_b, b_b) = per_dir
        wih_cat = jnp.concatenate([wih_f, wih_b], axis=1)         # [in_l, 2H]
        whh_bd = jnp.zeros((2 * H, 2 * H), jnp.bfloat16)
        whh_bd = whh_bd.at[:H, :H].set(whh_f).at[H:, H:].set(whh_b)
        b_cat = jnp.concatenate([b_f, b_b], axis=1)               # [1, 2H]
        layers.append((wih_cat, whh_bd, b_cat))
    p['rnn'] = layers

    # project: Linear(2H, E) + LayerNorm(E) + Linear(E, vocab)
    key, k1, k2, k3, k4 = jax.random.split(key, 5)
    p['w1'] = _rnd(k1, (2 * H, E))
    p['b1'] = _rnd(k2, (1, E))
    p['g1'] = jnp.ones((1, E), jnp.bfloat16)
    p['bt1'] = jnp.zeros((1, E), jnp.bfloat16)
    w2 = _rnd(k3, (E, vocab_size))
    b2 = _rnd(k4, (1, vocab_size))
    # zero-pad vocab to a full lane width -> unmasked final store
    p['w2p'] = jnp.zeros((E, Vpad), jnp.bfloat16).at[:, :vocab_size].set(w2)
    p['b2p'] = jnp.zeros((1, Vpad), jnp.bfloat16).at[:, :vocab_size].set(b2)
    return p


# --------------------------------------------------------------------------
if __name__ == "__main__":
    vocab_size = 64
    token_len = 8
    embed_dim = 32
    hypertoken_size = 32
    num_layers = 2
    batch = 2

    key = jax.random.PRNGKey(0)
    key, pkey, xkey = jax.random.split(key, 3)
    params = init_params(pkey, vocab_size, token_len, embed_dim,
                         hypertoken_size, num_layers)
    z = jax.random.normal(xkey, (batch, hypertoken_size),
                          jnp.float32).astype(jnp.bfloat16)

    fwd = jax.jit(functools.partial(decoder_forward, token_len=token_len,
                                    num_layers=num_layers,
                                    vocab_size=vocab_size))
    logits = fwd(params, z)
    jax.block_until_ready(logits)

    assert logits.shape == (batch, token_len, vocab_size), logits.shape
    assert logits.dtype == jnp.bfloat16, logits.dtype
    assert bool(jnp.all(jnp.isfinite(logits.astype(jnp.float32))))
    print("KERNEL_OK")
</pallas_src>

<mosaic_0001>
module attributes {stable_mosaic.version = 11 : i64} {
  func.func @_decoder_kernel(%arg0: memref<2x32xbf16, #tpu.memory_space<vmem>>, %arg1: memref<32x64xbf16, #tpu.memory_space<vmem>>, %arg2: memref<1x64xbf16, #tpu.memory_space<vmem>>, %arg3: memref<1x64xbf16, #tpu.memory_space<vmem>>, %arg4: memref<1x64xbf16, #tpu.memory_space<vmem>>, %arg5: memref<8x64xbf16, #tpu.memory_space<vmem>>, %arg6: memref<64x128xbf16, #tpu.memory_space<vmem>>, %arg7: memref<128x128xbf16, #tpu.memory_space<vmem>>, %arg8: memref<1x128xbf16, #tpu.memory_space<vmem>>, %arg9: memref<128x128xbf16, #tpu.memory_space<vmem>>, %arg10: memref<128x128xbf16, #tpu.memory_space<vmem>>, %arg11: memref<1x128xbf16, #tpu.memory_space<vmem>>, %arg12: memref<128x32xbf16, #tpu.memory_space<vmem>>, %arg13: memref<1x32xbf16, #tpu.memory_space<vmem>>, %arg14: memref<1x32xbf16, #tpu.memory_space<vmem>>, %arg15: memref<1x32xbf16, #tpu.memory_space<vmem>>, %arg16: memref<32x128xbf16, #tpu.memory_space<vmem>>, %arg17: memref<1x128xbf16, #tpu.memory_space<vmem>>, %arg18: memref<16x128xbf16, #tpu.memory_space<vmem>>) attributes {dimension_semantics = [], scalar_prefetch = 0 : i64, scratch_operands = 0 : i64, tpu.core_type = #tpu.core_type<tc>} {
    %c0 = arith.constant 0 : index
    %c0_0 = arith.constant 0 : index
    %0 = vector.load %arg0[%c0, %c0_0] : memref<2x32xbf16, #tpu.memory_space<vmem>>, vector<2x32xbf16>
    %c0_1 = arith.constant 0 : index
    %c0_2 = arith.constant 0 : index
    %1 = vector.load %arg1[%c0_1, %c0_2] : memref<32x64xbf16, #tpu.memory_space<vmem>>, vector<32x64xbf16>
    %cst = arith.constant dense<0.000000e+00> : vector<2x64xf32>
    %2 = tpu.matmul %0, %1, %cst {dimension_numbers = #tpu.dot_dimension_numbers<[1], [0], [0], [1], [0, 0, 1, 1], [], []>} : vector<2x32xbf16>, vector<32x64xbf16>, vector<2x64xf32> -> vector<2x64xf32>
    %c0_3 = arith.constant 0 : index
    %c0_4 = arith.constant 0 : index
    %3 = vector.load %arg2[%c0_3, %c0_4] : memref<1x64xbf16, #tpu.memory_space<vmem>>, vector<1x64xbf16>
    %4 = arith.extf %3 : vector<1x64xbf16> to vector<1x64xf32>
    %5 = vector.broadcast %4 : vector<1x64xf32> to vector<2x64xf32>
    %6 = arith.addf %2, %5 : vector<2x64xf32>
    %c0_5 = arith.constant 0 : index
    %c0_6 = arith.constant 0 : index
    %7 = vector.load %arg3[%c0_5, %c0_6] : memref<1x64xbf16, #tpu.memory_space<vmem>>, vector<1x64xbf16>
    %8 = arith.extf %7 : vector<1x64xbf16> to vector<1x64xf32>
    %c0_7 = arith.constant 0 : index
    %c0_8 = arith.constant 0 : index
    %9 = vector.load %arg4[%c0_7, %c0_8] : memref<1x64xbf16, #tpu.memory_space<vmem>>, vector<1x64xbf16>
    %10 = arith.extf %9 : vector<1x64xbf16> to vector<1x64xf32>
    %cst_9 = arith.constant dense<0.000000e+00> : vector<2xf32>
    %11 = vector.multi_reduction <add>, %6, %cst_9 [1] : vector<2x64xf32> to vector<2xf32>
    %12 = vector.shape_cast %11 : vector<2xf32> to vector<2x1xf32>
    %cst_10 = arith.constant 6.400000e+01 : f32
    %13 = vector.broadcast %cst_10 : f32 to vector<2x1xf32>
    %14 = arith.divf %12, %13 : vector<2x1xf32>
    %15 = vector.broadcast %14 : vector<2x1xf32> to vector<2x64xf32>
    %16 = arith.subf %6, %15 : vector<2x64xf32>
    %17 = arith.mulf %16, %16 : vector<2x64xf32>
    %cst_11 = arith.constant dense<0.000000e+00> : vector<2xf32>
    %18 = vector.multi_reduction <add>, %17, %cst_11 [1] : vector<2x64xf32> to vector<2xf32>
    %19 = vector.shape_cast %18 : vector<2xf32> to vector<2x1xf32>
    %cst_12 = arith.constant 6.400000e+01 : f32
    %20 = vector.broadcast %cst_12 : f32 to vector<2x1xf32>
    %21 = arith.divf %19, %20 : vector<2x1xf32>
    %22 = vector.broadcast %14 : vector<2x1xf32> to vector<2x64xf32>
    %23 = arith.subf %6, %22 : vector<2x64xf32>
    %cst_13 = arith.constant 9.99999974E-6 : f32
    %24 = vector.broadcast %cst_13 : f32 to vector<2x1xf32>
    %25 = arith.addf %21, %24 : vector<2x1xf32>
    %26 = math.rsqrt %25 : vector<2x1xf32>
    %27 = vector.broadcast %26 : vector<2x1xf32> to vector<2x64xf32>
    %28 = arith.mulf %23, %27 : vector<2x64xf32>
    %29 = vector.broadcast %8 : vector<1x64xf32> to vector<2x64xf32>
    %30 = arith.mulf %28, %29 : vector<2x64xf32>
    %31 = vector.broadcast %10 : vector<1x64xf32> to vector<2x64xf32>
    %32 = arith.addf %30, %31 : vector<2x64xf32>
    %cst_14 = arith.constant 0.000000e+00 : f32
    %33 = vector.broadcast %cst_14 : f32 to vector<2x64xf32>
    %34 = arith.maximumf %32, %33 : vector<2x64xf32>
    %35 = arith.truncf %34 : vector<2x64xf32> to vector<2x64xbf16>
    %c0_15 = arith.constant 0 : index
    %c0_16 = arith.constant 0 : index
    %36 = vector.load %arg5[%c0_15, %c0_16] : memref<8x64xbf16, #tpu.memory_space<vmem>>, vector<8x64xbf16>
    %37 = vector.extract_strided_slice %36 {offsets = [0, 0], sizes = [1, 64], strides = [1, 1]} : vector<8x64xbf16> to vector<1x64xbf16>
    %38 = vector.broadcast %37 : vector<1x64xbf16> to vector<2x64xbf16>
    %39 = arith.addf %35, %38 : vector<2x64xbf16>
    %40 = vector.extract_strided_slice %36 {offsets = [1, 0], sizes = [1, 64], strides = [1, 1]} : vector<8x64xbf16> to vector<1x64xbf16>
    %41 = vector.broadcast %40 : vector<1x64xbf16> to vector<2x64xbf16>
    %42 = arith.addf %35, %41 : vector<2x64xbf16>
    %43 = vector.extract_strided_slice %36 {offsets = [2, 0], sizes = [1, 64], strides = [1, 1]} : vector<8x64xbf16> to vector<1x64xbf16>
    %44 = vector.broadcast %43 : vector<1x64xbf16> to vector<2x64xbf16>
    %45 = arith.addf %35, %44 : vector<2x64xbf16>
    %46 = vector.extract_strided_slice %36 {offsets = [3, 0], sizes = [1, 64], strides = [1, 1]} : vector<8x64xbf16> to vector<1x64xbf16>
    %47 = vector.broadcast %46 : vector<1x64xbf16> to vector<2x64xbf16>
    %48 = arith.addf %35, %47 : vector<2x64xbf16>
    %49 = vector.extract_strided_slice %36 {offsets = [4, 0], sizes = [1, 64], strides = [1, 1]} : vector<8x64xbf16> to vector<1x64xbf16>
    %50 = vector.broadcast %49 : vector<1x64xbf16> to vector<2x64xbf16>
    %51 = arith.addf %35, %50 : vector<2x64xbf16>
    %52 = vector.extract_strided_slice %36 {offsets = [5, 0], sizes = [1, 64], strides = [1, 1]} : vector<8x64xbf16> to vector<1x64xbf16>
    %53 = vector.broadcast %52 : vector<1x64xbf16> to vector<2x64xbf16>
    %54 = arith.addf %35, %53 : vector<2x64xbf16>
    %55 = vector.extract_strided_slice %36 {offsets = [6, 0], sizes = [1, 64], strides = [1, 1]} : vector<8x64xbf16> to vector<1x64xbf16>
    %56 = vector.broadcast %55 : vector<1x64xbf16> to vector<2x64xbf16>
    %57 = arith.addf %35, %56 : vector<2x64xbf16>
    %58 = vector.extract_strided_slice %36 {offsets = [7, 0], sizes = [1, 64], strides = [1, 1]} : vector<8x64xbf16> to vector<1x64xbf16>
    %59 = vector.broadcast %58 : vector<1x64xbf16> to vector<2x64xbf16>
    %60 = arith.addf %35, %59 : vector<2x64xbf16>
    %61 = tpu.concatenate %39, %42, %45, %48, %51, %54, %57, %60 in 0 : vector<2x64xbf16>, vector<2x64xbf16>, vector<2x64xbf16>, vector<2x64xbf16>, vector<2x64xbf16>, vector<2x64xbf16>, vector<2x64xbf16>, vector<2x64xbf16> -> vector<16x64xbf16>
    %62 = tpu.concatenate %35, %35 in 1 : vector<2x64xbf16>, vector<2x64xbf16> -> vector<2x128xbf16>
    %c0_17 = arith.constant 0 : index
    %c0_18 = arith.constant 0 : index
    %63 = vector.load %arg6[%c0_17, %c0_18] : memref<64x128xbf16, #tpu.memory_space<vmem>>, vector<64x128xbf16>
    %c0_19 = arith.constant 0 : index
    %c0_20 = arith.constant 0 : index
    %64 = vector.load %arg7[%c0_19, %c0_20] : memref<128x128xbf16, #tpu.memory_space<vmem>>, vector<128x128xbf16>
    %c0_21 = arith.constant 0 : index
    %c0_22 = arith.constant 0 : index
    %65 = vector.load %arg8[%c0_21, %c0_22] : memref<1x128xbf16, #tpu.memory_space<vmem>>, vector<1x128xbf16>
    %cst_23 = arith.constant dense<0.000000e+00> : vector<16x128xf32>
    %66 = tpu.matmul %61, %63, %cst_23 {dimension_numbers = #tpu.dot_dimension_numbers<[1], [0], [0], [1], [0, 0, 1, 1], [], []>} : vector<16x64xbf16>, vector<64x128xbf16>, vector<16x128xf32> -> vector<16x128xf32>
    %67 = arith.extf %65 : vector<1x128xbf16> to vector<1x128xf32>
    %68 = vector.broadcast %67 : vector<1x128xf32> to vector<16x128xf32>
    %69 = arith.addf %66, %68 : vector<16x128xf32>
    %70 = vector.extract_strided_slice %69 {offsets = [0, 0], sizes = [2, 64], strides = [1, 1]} : vector<16x128xf32> to vector<2x64xf32>
    %71 = vector.extract_strided_slice %69 {offsets = [14, 64], sizes = [2, 64], strides = [1, 1]} : vector<16x128xf32> to vector<2x64xf32>
    %72 = tpu.concatenate %70, %71 in 1 : vector<2x64xf32>, vector<2x64xf32> -> vector<2x128xf32>
    %cst_24 = arith.constant dense<0.000000e+00> : vector<2x128xf32>
    %73 = tpu.matmul %62, %64, %cst_24 {dimension_numbers = #tpu.dot_dimension_numbers<[1], [0], [0], [1], [0, 0, 1, 1], [], []>} : vector<2x128xbf16>, vector<128x128xbf16>, vector<2x128xf32> -> vector<2x128xf32>
    %74 = arith.addf %72, %73 : vector<2x128xf32>
    %cst_25 = arith.constant 0.000000e+00 : f32
    %75 = vector.broadcast %cst_25 : f32 to vector<2x128xf32>
    %76 = arith.maximumf %74, %75 : vector<2x128xf32>
    %77 = arith.truncf %76 : vector<2x128xf32> to vector<2x128xbf16>
    %78 = vector.extract_strided_slice %77 {offsets = [0, 0], sizes = [2, 64], strides = [1, 1]} : vector<2x128xbf16> to vector<2x64xbf16>
    %79 = vector.extract_strided_slice %77 {offsets = [0, 64], sizes = [2, 64], strides = [1, 1]} : vector<2x128xbf16> to vector<2x64xbf16>
    %80 = vector.extract_strided_slice %69 {offsets = [2, 0], sizes = [2, 64], strides = [1, 1]} : vector<16x128xf32> to vector<2x64xf32>
    %81 = vector.extract_strided_slice %69 {offsets = [12, 64], sizes = [2, 64], strides = [1, 1]} : vector<16x128xf32> to vector<2x64xf32>
    %82 = tpu.concatenate %80, %81 in 1 : vector<2x64xf32>, vector<2x64xf32> -> vector<2x128xf32>
    %cst_26 = arith.constant dense<0.000000e+00> : vector<2x128xf32>
    %83 = tpu.matmul %77, %64, %cst_26 {dimension_numbers = #tpu.dot_dimension_numbers<[1], [0], [0], [1], [0, 0, 1, 1], [], []>} : vector<2x128xbf16>, vector<128x128xbf16>, vector<2x128xf32> -> vector<2x128xf32>
    %84 = arith.addf %82, %83 : vector<2x128xf32>
    %cst_27 = arith.constant 0.000000e+00 : f32
    %85 = vector.broadcast %cst_27 : f32 to vector<2x128xf32>
    %86 = arith.maximumf %84, %85 : vector<2x128xf32>
    %87 = arith.truncf %86 : vector<2x128xf32> to vector<2x128xbf16>
    %88 = vector.extract_strided_slice %87 {offsets = [0, 0], sizes = [2, 64], strides = [1, 1]} : vector<2x128xbf16> to vector<2x64xbf16>
    %89 = vector.extract_strided_slice %87 {offsets = [0, 64], sizes = [2, 64], strides = [1, 1]} : vector<2x128xbf16> to vector<2x64xbf16>
    %90 = vector.extract_strided_slice %69 {offsets = [4, 0], sizes = [2, 64], strides = [1, 1]} : vector<16x128xf32> to vector<2x64xf32>
    %91 = vector.extract_strided_slice %69 {offsets = [10, 64], sizes = [2, 64], strides = [1, 1]} : vector<16x128xf32> to vector<2x64xf32>
    %92 = tpu.concatenate %90, %91 in 1 : vector<2x64xf32>, vector<2x64xf32> -> vector<2x128xf32>
    %cst_28 = arith.constant dense<0.000000e+00> : vector<2x128xf32>
    %93 = tpu.matmul %87, %64, %cst_28 {dimension_numbers = #tpu.dot_dimension_numbers<[1], [0], [0], [1], [0, 0, 1, 1], [], []>} : vector<2x128xbf16>, vector<128x128xbf16>, vector<2x128xf32> -> vector<2x128xf32>
    %94 = arith.addf %92, %93 : vector<2x128xf32>
    %cst_29 = arith.constant 0.000000e+00 : f32
    %95 = vector.broadcast %cst_29 : f32 to vector<2x128xf32>
    %96 = arith.maximumf %94, %95 : vector<2x128xf32>
    %97 = arith.truncf %96 : vector<2x128xf32> to vector<2x128xbf16>
    %98 = vector.extract_strided_slice %97 {offsets = [0, 0], sizes = [2, 64], strides = [1, 1]} : vector<2x128xbf16> to vector<2x64xbf16>
    %99 = vector.extract_strided_slice %97 {offsets = [0, 64], sizes = [2, 64], strides = [1, 1]} : vector<2x128xbf16> to vector<2x64xbf16>
    %100 = vector.extract_strided_slice %69 {offsets = [6, 0], sizes = [2, 64], strides = [1, 1]} : vector<16x128xf32> to vector<2x64xf32>
    %101 = vector.extract_strided_slice %69 {offsets = [8, 64], sizes = [2, 64], strides = [1, 1]} : vector<16x128xf32> to vector<2x64xf32>
    %102 = tpu.concatenate %100, %101 in 1 : vector<2x64xf32>, vector<2x64xf32> -> vector<2x128xf32>
    %cst_30 = arith.constant dense<0.000000e+00> : vector<2x128xf32>
    %103 = tpu.matmul %97, %64, %cst_30 {dimension_numbers = #tpu.dot_dimension_numbers<[1], [0], [0], [1], [0, 0, 1, 1], [], []>} : vector<2x128xbf16>, vector<128x128xbf16>, vector<2x128xf32> -> vector<2x128xf32>
    %104 = arith.addf %102, %103 : vector<2x128xf32>
    %cst_31 = arith.constant 0.000000e+00 : f32
    %105 = vector.broadcast %cst_31 : f32 to vector<2x128xf32>
    %106 = arith.maximumf %104, %105 : vector<2x128xf32>
    %107 = arith.truncf %106 : vector<2x128xf32> to vector<2x128xbf16>
    %108 = vector.extract_strided_slice %107 {offsets = [0, 0], sizes = [2, 64], strides = [1, 1]} : vector<2x128xbf16> to vector<2x64xbf16>
    %109 = vector.extract_strided_slice %107 {offsets = [0, 64], sizes = [2, 64], strides = [1, 1]} : vector<2x128xbf16> to vector<2x64xbf16>
    %110 = vector.extract_strided_slice %69 {offsets = [8, 0], sizes = [2, 64], strides = [1, 1]} : vector<16x128xf32> to vector<2x64xf32>
    %111 = vector.extract_strided_slice %69 {offsets = [6, 64], sizes = [2, 64], strides = [1, 1]} : vector<16x128xf32> to vector<2x64xf32>
    %112 = tpu.concatenate %110, %111 in 1 : vector<2x64xf32>, vector<2x64xf32> -> vector<2x128xf32>
    %cst_32 = arith.constant dense<0.000000e+00> : vector<2x128xf32>
    %113 = tpu.matmul %107, %64, %cst_32 {dimension_numbers = #tpu.dot_dimension_numbers<[1], [0], [0], [1], [0, 0, 1, 1], [], []>} : vector<2x128xbf16>, vector<128x128xbf16>, vector<2x128xf32> -> vector<2x128xf32>
    %114 = arith.addf %112, %113 : vector<2x128xf32>
    %cst_33 = arith.constant 0.000000e+00 : f32
    %115 = vector.broadcast %cst_33 : f32 to vector<2x128xf32>
    %116 = arith.maximumf %114, %115 : vector<2x128xf32>
    %117 = arith.truncf %116 : vector<2x128xf32> to vector<2x128xbf16>
    %118 = vector.extract_strided_slice %117 {offsets = [0, 0], sizes = [2, 64], strides = [1, 1]} : vector<2x128xbf16> to vector<2x64xbf16>
    %119 = vector.extract_strided_slice %117 {offsets = [0, 64], sizes = [2, 64], strides = [1, 1]} : vector<2x128xbf16> to vector<2x64xbf16>
    %120 = vector.extract_strided_slice %69 {offsets = [10, 0], sizes = [2, 64], strides = [1, 1]} : vector<16x128xf32> to vector<2x64xf32>
    %121 = vector.extract_strided_slice %69 {offsets = [4, 64], sizes = [2, 64], strides = [1, 1]} : vector<16x128xf32> to vector<2x64xf32>
    %122 = tpu.concatenate %120, %121 in 1 : vector<2x64xf32>, vector<2x64xf32> -> vector<2x128xf32>
    %cst_34 = arith.constant dense<0.000000e+00> : vector<2x128xf32>
    %123 = tpu.matmul %117, %64, %cst_34 {dimension_numbers = #tpu.dot_dimension_numbers<[1], [0], [0], [1], [0, 0, 1, 1], [], []>} : vector<2x128xbf16>, vector<128x128xbf16>, vector<2x128xf32> -> vector<2x128xf32>
    %124 = arith.addf %122, %123 : vector<2x128xf32>
    %cst_35 = arith.constant 0.000000e+00 : f32
    %125 = vector.broadcast %cst_35 : f32 to vector<2x128xf32>
    %126 = arith.maximumf %124, %125 : vector<2x128xf32>
    %127 = arith.truncf %126 : vector<2x128xf32> to vector<2x128xbf16>
    %128 = vector.extract_strided_slice %127 {offsets = [0, 0], sizes = [2, 64], strides = [1, 1]} : vector<2x128xbf16> to vector<2x64xbf16>
    %129 = vector.extract_strided_slice %127 {offsets = [0, 64], sizes = [2, 64], strides = [1, 1]} : vector<2x128xbf16> to vector<2x64xbf16>
    %130 = vector.extract_strided_slice %69 {offsets = [12, 0], sizes = [2, 64], strides = [1, 1]} : vector<16x128xf32> to vector<2x64xf32>
    %131 = vector.extract_strided_slice %69 {offsets = [2, 64], sizes = [2, 64], strides = [1, 1]} : vector<16x128xf32> to vector<2x64xf32>
    %132 = tpu.concatenate %130, %131 in 1 : vector<2x64xf32>, vector<2x64xf32> -> vector<2x128xf32>
    %cst_36 = arith.constant dense<0.000000e+00> : vector<2x128xf32>
    %133 = tpu.matmul %127, %64, %cst_36 {dimension_numbers = #tpu.dot_dimension_numbers<[1], [0], [0], [1], [0, 0, 1, 1], [], []>} : vector<2x128xbf16>, vector<128x128xbf16>, vector<2x128xf32> -> vector<2x128xf32>
    %134 = arith.addf %132, %133 : vector<2x128xf32>
    %cst_37 = arith.constant 0.000000e+00 : f32
    %135 = vector.broadcast %cst_37 : f32 to vector<2x128xf32>
    %136 = arith.maximumf %134, %135 : vector<2x128xf32>
    %137 = arith.truncf %136 : vector<2x128xf32> to vector<2x128xbf16>
    %138 = vector.extract_strided_slice %137 {offsets = [0, 0], sizes = [2, 64], strides = [1, 1]} : vector<2x128xbf16> to vector<2x64xbf16>
    %139 = vector.extract_strided_slice %137 {offsets = [0, 64], sizes = [2, 64], strides = [1, 1]} : vector<2x128xbf16> to vector<2x64xbf16>
    %140 = vector.extract_strided_slice %69 {offsets = [14, 0], sizes = [2, 64], strides = [1, 1]} : vector<16x128xf32> to vector<2x64xf32>
    %141 = vector.extract_strided_slice %69 {offsets = [0, 64], sizes = [2, 64], strides = [1, 1]} : vector<16x128xf32> to vector<2x64xf32>
    %142 = tpu.concatenate %140, %141 in 1 : vector<2x64xf32>, vector<2x64xf32> -> vector<2x128xf32>
    %cst_38 = arith.constant dense<0.000000e+00> : vector<2x128xf32>
    %143 = tpu.matmul %137, %64, %cst_38 {dimension_numbers = #tpu.dot_dimension_numbers<[1], [0], [0], [1], [0, 0, 1, 1], [], []>} : vector<2x128xbf16>, vector<128x128xbf16>, vector<2x128xf32> -> vector<2x128xf32>
    %144 = arith.addf %142, %143 : vector<2x128xf32>
    %cst_39 = arith.constant 0.000000e+00 : f32
    %145 = vector.broadcast %cst_39 : f32 to vector<2x128xf32>
    %146 = arith.maximumf %144, %145 : vector<2x128xf32>
    %147 = arith.truncf %146 : vector<2x128xf32> to vector<2x128xbf16>
    %148 = vector.extract_strided_slice %147 {offsets = [0, 0], sizes = [2, 64], strides = [1, 1]} : vector<2x128xbf16> to vector<2x64xbf16>
    %149 = vector.extract_strided_slice %147 {offsets = [0, 64], sizes = [2, 64], strides = [1, 1]} : vector<2x128xbf16> to vector<2x64xbf16>
    %150 = tpu.concatenate %78, %149 in 1 : vector<2x64xbf16>, vector<2x64xbf16> -> vector<2x128xbf16>
    %151 = tpu.concatenate %88, %139 in 1 : vector<2x64xbf16>, vector<2x64xbf16> -> vector<2x128xbf16>
    %152 = tpu.concatenate %98, %129 in 1 : vector<2x64xbf16>, vector<2x64xbf16> -> vector<2x128xbf16>
    %153 = tpu.concatenate %108, %119 in 1 : vector<2x64xbf16>, vector<2x64xbf16> -> vector<2x128xbf16>
    %154 = tpu.concatenate %118, %109 in 1 : vector<2x64xbf16>, vector<2x64xbf16> -> vector<2x128xbf16>
    %155 = tpu.concatenate %128, %99 in 1 : vector<2x64xbf16>, vector<2x64xbf16> -> vector<2x128xbf16>
    %156 = tpu.concatenate %138, %89 in 1 : vector<2x64xbf16>, vector<2x64xbf16> -> vector<2x128xbf16>
    %157 = tpu.concatenate %148, %79 in 1 : vector<2x64xbf16>, vector<2x64xbf16> -> vector<2x128xbf16>
    %158 = tpu.concatenate %150, %151, %152, %153, %154, %155, %156, %157 in 0 : vector<2x128xbf16>, vector<2x128xbf16>, vector<2x128xbf16>, vector<2x128xbf16>, vector<2x128xbf16>, vector<2x128xbf16>, vector<2x128xbf16>, vector<2x128xbf16> -> vector<16x128xbf16>
    %c0_40 = arith.constant 0 : index
    %c0_41 = arith.constant 0 : index
    %159 = vector.load %arg9[%c0_40, %c0_41] : memref<128x128xbf16, #tpu.memory_space<vmem>>, vector<128x128xbf16>
    %c0_42 = arith.constant 0 : index
    %c0_43 = arith.constant 0 : index
    %160 = vector.load %arg10[%c0_42, %c0_43] : memref<128x128xbf16, #tpu.memory_space<vmem>>, vector<128x128xbf16>
    %c0_44 = arith.constant 0 : index
    %c0_45 = arith.constant 0 : index
    %161 = vector.load %arg11[%c0_44, %c0_45] : memref<1x128xbf16, #tpu.memory_space<vmem>>, vector<1x128xbf16>
    %cst_46 = arith.constant dense<0.000000e+00> : vector<16x128xf32>
    %162 = tpu.matmul %158, %159, %cst_46 {dimension_numbers = #tpu.dot_dimension_numbers<[1], [0], [0], [1], [0, 0, 1, 1], [], []>} : vector<16x128xbf16>, vector<128x128xbf16>, vector<16x128xf32> -> vector<16x128xf32>
    %163 = arith.extf %161 : vector<1x128xbf16> to vector<1x128xf32>
    %164 = vector.broadcast %163 : vector<1x128xf32> to vector<16x128xf32>
    %165 = arith.addf %162, %164 : vector<16x128xf32>
    %166 = vector.extract_strided_slice %165 {offsets = [0, 0], sizes = [2, 64], strides = [1, 1]} : vector<16x128xf32> to vector<2x64xf32>
    %167 = vector.extract_strided_slice %165 {offsets = [14, 64], sizes = [2, 64], strides = [1, 1]} : vector<16x128xf32> to vector<2x64xf32>
    %168 = tpu.concatenate %166, %167 in 1 : vector<2x64xf32>, vector<2x64xf32> -> vector<2x128xf32>
    %cst_47 = arith.constant dense<0.000000e+00> : vector<2x128xf32>
    %169 = tpu.matmul %62, %160, %cst_47 {dimension_numbers = #tpu.dot_dimension_numbers<[1], [0], [0], [1], [0, 0, 1, 1], [], []>} : vector<2x128xbf16>, vector<128x128xbf16>, vector<2x128xf32> -> vector<2x128xf32>
    %170 = arith.addf %168, %169 : vector<2x128xf32>
    %cst_48 = arith.constant 0.000000e+00 : f32
    %171 = vector.broadcast %cst_48 : f32 to vector<2x128xf32>
    %172 = arith.maximumf %170, %171 : vector<2x128xf32>
    %173 = arith.truncf %172 : vector<2x128xf32> to vector<2x128xbf16>
    %174 = vector.extract_strided_slice %173 {offsets = [0, 0], sizes = [2, 64], strides = [1, 1]} : vector<2x128xbf16> to vector<2x64xbf16>
    %175 = vector.extract_strided_slice %173 {offsets = [0, 64], sizes = [2, 64], strides = [1, 1]} : vector<2x128xbf16> to vector<2x64xbf16>
    %176 = vector.extract_strided_slice %165 {offsets = [2, 0], sizes = [2, 64], strides = [1, 1]} : vector<16x128xf32> to vector<2x64xf32>
    %177 = vector.extract_strided_slice %165 {offsets = [12, 64], sizes = [2, 64], strides = [1, 1]} : vector<16x128xf32> to vector<2x64xf32>
    %178 = tpu.concatenate %176, %177 in 1 : vector<2x64xf32>, vector<2x64xf32> -> vector<2x128xf32>
    %cst_49 = arith.constant dense<0.000000e+00> : vector<2x128xf32>
    %179 = tpu.matmul %173, %160, %cst_49 {dimension_numbers = #tpu.dot_dimension_numbers<[1], [0], [0], [1], [0, 0, 1, 1], [], []>} : vector<2x128xbf16>, vector<128x128xbf16>, vector<2x128xf32> -> vector<2x128xf32>
    %180 = arith.addf %178, %179 : vector<2x128xf32>
    %cst_50 = arith.constant 0.000000e+00 : f32
    %181 = vector.broadcast %cst_50 : f32 to vector<2x128xf32>
    %182 = arith.maximumf %180, %181 : vector<2x128xf32>
    %183 = arith.truncf %182 : vector<2x128xf32> to vector<2x128xbf16>
    %184 = vector.extract_strided_slice %183 {offsets = [0, 0], sizes = [2, 64], strides = [1, 1]} : vector<2x128xbf16> to vector<2x64xbf16>
    %185 = vector.extract_strided_slice %183 {offsets = [0, 64], sizes = [2, 64], strides = [1, 1]} : vector<2x128xbf16> to vector<2x64xbf16>
    %186 = vector.extract_strided_slice %165 {offsets = [4, 0], sizes = [2, 64], strides = [1, 1]} : vector<16x128xf32> to vector<2x64xf32>
    %187 = vector.extract_strided_slice %165 {offsets = [10, 64], sizes = [2, 64], strides = [1, 1]} : vector<16x128xf32> to vector<2x64xf32>
    %188 = tpu.concatenate %186, %187 in 1 : vector<2x64xf32>, vector<2x64xf32> -> vector<2x128xf32>
    %cst_51 = arith.constant dense<0.000000e+00> : vector<2x128xf32>
    %189 = tpu.matmul %183, %160, %cst_51 {dimension_numbers = #tpu.dot_dimension_numbers<[1], [0], [0], [1], [0, 0, 1, 1], [], []>} : vector<2x128xbf16>, vector<128x128xbf16>, vector<2x128xf32> -> vector<2x128xf32>
    %190 = arith.addf %188, %189 : vector<2x128xf32>
    %cst_52 = arith.constant 0.000000e+00 : f32
    %191 = vector.broadcast %cst_52 : f32 to vector<2x128xf32>
    %192 = arith.maximumf %190, %191 : vector<2x128xf32>
    %193 = arith.truncf %192 : vector<2x128xf32> to vector<2x128xbf16>
    %194 = vector.extract_strided_slice %193 {offsets = [0, 0], sizes = [2, 64], strides = [1, 1]} : vector<2x128xbf16> to vector<2x64xbf16>
    %195 = vector.extract_strided_slice %193 {offsets = [0, 64], sizes = [2, 64], strides = [1, 1]} : vector<2x128xbf16> to vector<2x64xbf16>
    %196 = vector.extract_strided_slice %165 {offsets = [6, 0], sizes = [2, 64], strides = [1, 1]} : vector<16x128xf32> to vector<2x64xf32>
    %197 = vector.extract_strided_slice %165 {offsets = [8, 64], sizes = [2, 64], strides = [1, 1]} : vector<16x128xf32> to vector<2x64xf32>
    %198 = tpu.concatenate %196, %197 in 1 : vector<2x64xf32>, vector<2x64xf32> -> vector<2x128xf32>
    %cst_53 = arith.constant dense<0.000000e+00> : vector<2x128xf32>
    %199 = tpu.matmul %193, %160, %cst_53 {dimension_numbers = #tpu.dot_dimension_numbers<[1], [0], [0], [1], [0, 0, 1, 1], [], []>} : vector<2x128xbf16>, vector<128x128xbf16>, vector<2x128xf32> -> vector<2x128xf32>
    %200 = arith.addf %198, %199 : vector<2x128xf32>
    %cst_54 = arith.constant 0.000000e+00 : f32
    %201 = vector.broadcast %cst_54 : f32 to vector<2x128xf32>
    %202 = arith.maximumf %200, %201 : vector<2x128xf32>
    %203 = arith.truncf %202 : vector<2x128xf32> to vector<2x128xbf16>
    %204 = vector.extract_strided_slice %203 {offsets = [0, 0], sizes = [2, 64], strides = [1, 1]} : vector<2x128xbf16> to vector<2x64xbf16>
    %205 = vector.extract_strided_slice %203 {offsets = [0, 64], sizes = [2, 64], strides = [1, 1]} : vector<2x128xbf16> to vector<2x64xbf16>
    %206 = vector.extract_strided_slice %165 {offsets = [8, 0], sizes = [2, 64], strides = [1, 1]} : vector<16x128xf32> to vector<2x64xf32>
    %207 = vector.extract_strided_slice %165 {offsets = [6, 64], sizes = [2, 64], strides = [1, 1]} : vector<16x128xf32> to vector<2x64xf32>
    %208 = tpu.concatenate %206, %207 in 1 : vector<2x64xf32>, vector<2x64xf32> -> vector<2x128xf32>
    %cst_55 = arith.constant dense<0.000000e+00> : vector<2x128xf32>
    %209 = tpu.matmul %203, %160, %cst_55 {dimension_numbers = #tpu.dot_dimension_numbers<[1], [0], [0], [1], [0, 0, 1, 1], [], []>} : vector<2x128xbf16>, vector<128x128xbf16>, vector<2x128xf32> -> vector<2x128xf32>
    %210 = arith.addf %208, %209 : vector<2x128xf32>
    %cst_56 = arith.constant 0.000000e+00 : f32
    %211 = vector.broadcast %cst_56 : f32 to vector<2x128xf32>
    %212 = arith.maximumf %210, %211 : vector<2x128xf32>
    %213 = arith.truncf %212 : vector<2x128xf32> to vector<2x128xbf16>
    %214 = vector.extract_strided_slice %213 {offsets = [0, 0], sizes = [2, 64], strides = [1, 1]} : vector<2x128xbf16> to vector<2x64xbf16>
    %215 = vector.extract_strided_slice %213 {offsets = [0, 64], sizes = [2, 64], strides = [1, 1]} : vector<2x128xbf16> to vector<2x64xbf16>
    %216 = vector.extract_strided_slice %165 {offsets = [10, 0], sizes = [2, 64], strides = [1, 1]} : vector<16x128xf32> to vector<2x64xf32>
    %217 = vector.extract_strided_slice %165 {offsets = [4, 64], sizes = [2, 64], strides = [1, 1]} : vector<16x128xf32> to vector<2x64xf32>
    %218 = tpu.concatenate %216, %217 in 1 : vector<2x64xf32>, vector<2x64xf32> -> vector<2x128xf32>
    %cst_57 = arith.constant dense<0.000000e+00> : vector<2x128xf32>
    %219 = tpu.matmul %213, %160, %cst_57 {dimension_numbers = #tpu.dot_dimension_numbers<[1], [0], [0], [1], [0, 0, 1, 1], [], []>} : vector<2x128xbf16>, vector<128x128xbf16>, vector<2x128xf32> -> vector<2x128xf32>
    %220 = arith.addf %218, %219 : vector<2x128xf32>
    %cst_58 = arith.constant 0.000000e+00 : f32
    %221 = vector.broadcast %cst_58 : f32 to vector<2x128xf32>
    %222 = arith.maximumf %220, %221 : vector<2x128xf32>
    %223 = arith.truncf %222 : vector<2x128xf32> to vector<2x128xbf16>
    %224 = vector.extract_strided_slice %223 {offsets = [0, 0], sizes = [2, 64], strides = [1, 1]} : vector<2x128xbf16> to vector<2x64xbf16>
    %225 = vector.extract_strided_slice %223 {offsets = [0, 64], sizes = [2, 64], strides = [1, 1]} : vector<2x128xbf16> to vector<2x64xbf16>
    %226 = vector.extract_strided_slice %165 {offsets = [12, 0], sizes = [2, 64], strides = [1, 1]} : vector<16x128xf32> to vector<2x64xf32>
    %227 = vector.extract_strided_slice %165 {offsets = [2, 64], sizes = [2, 64], strides = [1, 1]} : vector<16x128xf32> to vector<2x64xf32>
    %228 = tpu.concatenate %226, %227 in 1 : vector<2x64xf32>, vector<2x64xf32> -> vector<2x128xf32>
    %cst_59 = arith.constant dense<0.000000e+00> : vector<2x128xf32>
    %229 = tpu.matmul %223, %160, %cst_59 {dimension_numbers = #tpu.dot_dimension_numbers<[1], [0], [0], [1], [0, 0, 1, 1], [], []>} : vector<2x128xbf16>, vector<128x128xbf16>, vector<2x128xf32> -> vector<2x128xf32>
    %230 = arith.addf %228, %229 : vector<2x128xf32>
    %cst_60 = arith.constant 0.000000e+00 : f32
    %231 = vector.broadcast %cst_60 : f32 to vector<2x128xf32>
    %232 = arith.maximumf %230, %231 : vector<2x128xf32>
    %233 = arith.truncf %232 : vector<2x128xf32> to vector<2x128xbf16>
    %234 = vector.extract_strided_slice %233 {offsets = [0, 0], sizes = [2, 64], strides = [1, 1]} : vector<2x128xbf16> to vector<2x64xbf16>
    %235 = vector.extract_strided_slice %233 {offsets = [0, 64], sizes = [2, 64], strides = [1, 1]} : vector<2x128xbf16> to vector<2x64xbf16>
    %236 = vector.extract_strided_slice %165 {offsets = [14, 0], sizes = [2, 64], strides = [1, 1]} : vector<16x128xf32> to vector<2x64xf32>
    %237 = vector.extract_strided_slice %165 {offsets = [0, 64], sizes = [2, 64], strides = [1, 1]} : vector<16x128xf32> to vector<2x64xf32>
    %238 = tpu.concatenate %236, %237 in 1 : vector<2x64xf32>, vector<2x64xf32> -> vector<2x128xf32>
    %cst_61 = arith.constant dense<0.000000e+00> : vector<2x128xf32>
    %239 = tpu.matmul %233, %160, %cst_61 {dimension_numbers = #tpu.dot_dimension_numbers<[1], [0], [0], [1], [0, 0, 1, 1], [], []>} : vector<2x128xbf16>, vector<128x128xbf16>, vector<2x128xf32> -> vector<2x128xf32>
    %240 = arith.addf %238, %239 : vector<2x128xf32>
    %cst_62 = arith.constant 0.000000e+00 : f32
    %241 = vector.broadcast %cst_62 : f32 to vector<2x128xf32>
    %242 = arith.maximumf %240, %241 : vector<2x128xf32>
    %243 = arith.truncf %242 : vector<2x128xf32> to vector<2x128xbf16>
    %244 = vector.extract_strided_slice %243 {offsets = [0, 0], sizes = [2, 64], strides = [1, 1]} : vector<2x128xbf16> to vector<2x64xbf16>
    %245 = vector.extract_strided_slice %243 {offsets = [0, 64], sizes = [2, 64], strides = [1, 1]} : vector<2x128xbf16> to vector<2x64xbf16>
    %246 = tpu.concatenate %174, %245 in 1 : vector<2x64xbf16>, vector<2x64xbf16> -> vector<2x128xbf16>
    %247 = tpu.concatenate %184, %235 in 1 : vector<2x64xbf16>, vector<2x64xbf16> -> vector<2x128xbf16>
    %248 = tpu.concatenate %194, %225 in 1 : vector<2x64xbf16>, vector<2x64xbf16> -> vector<2x128xbf16>
    %249 = tpu.concatenate %204, %215 in 1 : vector<2x64xbf16>, vector<2x64xbf16> -> vector<2x128xbf16>
    %250 = tpu.concatenate %214, %205 in 1 : vector<2x64xbf16>, vector<2x64xbf16> -> vector<2x128xbf16>
    %251 = tpu.concatenate %224, %195 in 1 : vector<2x64xbf16>, vector<2x64xbf16> -> vector<2x128xbf16>
    %252 = tpu.concatenate %234, %185 in 1 : vector<2x64xbf16>, vector<2x64xbf16> -> vector<2x128xbf16>
    %253 = tpu.concatenate %244, %175 in 1 : vector<2x64xbf16>, vector<2x64xbf16> -> vector<2x128xbf16>
    %254 = tpu.concatenate %246, %247, %248, %249, %250, %251, %252, %253 in 0 : vector<2x128xbf16>, vector<2x128xbf16>, vector<2x128xbf16>, vector<2x128xbf16>, vector<2x128xbf16>, vector<2x128xbf16>, vector<2x128xbf16>, vector<2x128xbf16> -> vector<16x128xbf16>
    %c0_63 = arith.constant 0 : index
    %c0_64 = arith.constant 0 : index
    %255 = vector.load %arg12[%c0_63, %c0_64] : memref<128x32xbf16, #tpu.memory_space<vmem>>, vector<128x32xbf16>
    %cst_65 = arith.constant dense<0.000000e+00> : vector<16x32xf32>
    %256 = tpu.matmul %254, %255, %cst_65 {dimension_numbers = #tpu.dot_dimension_numbers<[1], [0], [0], [1], [0, 0, 1, 1], [], []>} : vector<16x128xbf16>, vector<128x32xbf16>, vector<16x32xf32> -> vector<16x32xf32>
    %c0_66 = arith.constant 0 : index
    %c0_67 = arith.constant 0 : index
    %257 = vector.load %arg13[%c0_66, %c0_67] : memref<1x32xbf16, #tpu.memory_space<vmem>>, vector<1x32xbf16>
    %258 = arith.extf %257 : vector<1x32xbf16> to vector<1x32xf32>
    %259 = vector.broadcast %258 : vector<1x32xf32> to vector<16x32xf32>
    %260 = arith.addf %256, %259 : vector<16x32xf32>
    %c0_68 = arith.constant 0 : index
    %c0_69 = arith.constant 0 : index
    %261 = vector.load %arg14[%c0_68, %c0_69] : memref<1x32xbf16, #tpu.memory_space<vmem>>, vector<1x32xbf16>
    %262 = arith.extf %261 : vector<1x32xbf16> to vector<1x32xf32>
    %c0_70 = arith.constant 0 : index
    %c0_71 = arith.constant 0 : index
    %263 = vector.load %arg15[%c0_70, %c0_71] : memref<1x32xbf16, #tpu.memory_space<vmem>>, vector<1x32xbf16>
    %264 = arith.extf %263 : vector<1x32xbf16> to vector<1x32xf32>
    %cst_72 = arith.constant dense<0.000000e+00> : vector<16xf32>
    %265 = vector.multi_reduction <add>, %260, %cst_72 [1] : vector<16x32xf32> to vector<16xf32>
    %266 = vector.shape_cast %265 : vector<16xf32> to vector<16x1xf32>
    %cst_73 = arith.constant 3.200000e+01 : f32
    %267 = vector.broadcast %cst_73 : f32 to vector<16x1xf32>
    %268 = arith.divf %266, %267 : vector<16x1xf32>
    %269 = vector.broadcast %268 : vector<16x1xf32> to vector<16x32xf32>
    %270 = arith.subf %260, %269 : vector<16x32xf32>
    %271 = arith.mulf %270, %270 : vector<16x32xf32>
    %cst_74 = arith.constant dense<0.000000e+00> : vector<16xf32>
    %272 = vector.multi_reduction <add>, %271, %cst_74 [1] : vector<16x32xf32> to vector<16xf32>
    %273 = vector.shape_cast %272 : vector<16xf32> to vector<16x1xf32>
    %cst_75 = arith.constant 3.200000e+01 : f32
    %274 = vector.broadcast %cst_75 : f32 to vector<16x1xf32>
    %275 = arith.divf %273, %274 : vector<16x1xf32>
    %276 = vector.broadcast %268 : vector<16x1xf32> to vector<16x32xf32>
    %277 = arith.subf %260, %276 : vector<16x32xf32>
    %cst_76 = arith.constant 9.99999974E-6 : f32
    %278 = vector.broadcast %cst_76 : f32 to vector<16x1xf32>
    %279 = arith.addf %275, %278 : vector<16x1xf32>
    %280 = math.rsqrt %279 : vector<16x1xf32>
    %281 = vector.broadcast %280 : vector<16x1xf32> to vector<16x32xf32>
    %282 = arith.mulf %277, %281 : vector<16x32xf32>
    %283 = vector.broadcast %262 : vector<1x32xf32> to vector<16x32xf32>
    %284 = arith.mulf %282, %283 : vector<16x32xf32>
    %285 = vector.broadcast %264 : vector<1x32xf32> to vector<16x32xf32>
    %286 = arith.addf %284, %285 : vector<16x32xf32>
    %cst_77 = arith.constant 0.000000e+00 : f32
    %287 = vector.broadcast %cst_77 : f32 to vector<16x32xf32>
    %288 = arith.maximumf %286, %287 : vector<16x32xf32>
    %289 = arith.truncf %288 : vector<16x32xf32> to vector<16x32xbf16>
    %c0_78 = arith.constant 0 : index
    %c0_79 = arith.constant 0 : index
    %290 = vector.load %arg16[%c0_78, %c0_79] : memref<32x128xbf16, #tpu.memory_space<vmem>>, vector<32x128xbf16>
    %cst_80 = arith.constant dense<0.000000e+00> : vector<16x128xf32>
    %291 = tpu.matmul %289, %290, %cst_80 {dimension_numbers = #tpu.dot_dimension_numbers<[1], [0], [0], [1], [0, 0, 1, 1], [], []>} : vector<16x32xbf16>, vector<32x128xbf16>, vector<16x128xf32> -> vector<16x128xf32>
    %c0_81 = arith.constant 0 : index
    %c0_82 = arith.constant 0 : index
    %292 = vector.load %arg17[%c0_81, %c0_82] : memref<1x128xbf16, #tpu.memory_space<vmem>>, vector<1x128xbf16>
    %293 = arith.extf %292 : vector<1x128xbf16> to vector<1x128xf32>
    %294 = vector.broadcast %293 : vector<1x128xf32> to vector<16x128xf32>
    %295 = arith.addf %291, %294 : vector<16x128xf32>
    %296 = arith.truncf %295 : vector<16x128xf32> to vector<16x128xbf16>
    %c0_83 = arith.constant 0 : index
    %c0_84 = arith.constant 0 : index
    %297 = vector.load %arg18[%c0_83, %c0_84] : memref<16x128xbf16, #tpu.memory_space<vmem>>, vector<16x128xbf16>
    tpu.vector_store %arg18[%c0_83, %c0_84], %296 {strides = array<i32>} : memref<16x128xbf16, #tpu.memory_space<vmem>>, vector<16x128xbf16>,
    return
  }
}

</mosaic_0001>

<bundles_post_ra>
// kernel: decoder_forward.1
= control target key start
LH: loop header
LB: loop body
LE: loop exit
PB: predicated region body
PF: predicated region fallthrough
CT: control target
= control target key end

     0   :  { %s3705_s0 = inlined_call_operand.vmem [shape: bf16[2,32], index: 0, kind: input, shape index: {}]   ;;  %s3706_s1 = inlined_call_operand.vmem [shape: bf16[32,64], index: 1, kind: input, shape index: {}]   ;;  %s3707_s2 = inlined_call_operand.hbm [shape: bf16[1,64], index: 2, kind: input, shape index: {}]   ;;  %s3708_s3 = inlined_call_operand.hbm [shape: bf16[1,64], index: 3, kind: input, shape index: {}]   ;;  %s3709_s4 = inlined_call_operand.hbm [shape: bf16[1,64], index: 4, kind: input, shape index: {}]   ;;  %s3710_s5 = inlined_call_operand.hbm [shape: bf16[8,64], index: 5, kind: input, shape index: {}]   ;;  %s3711_s6 = inlined_call_operand.vmem [shape: bf16[64,128], index: 6, kind: input, shape index: {}]   ;;  %s3712_s7 = inlined_call_operand.vmem [shape: bf16[128,128], index: 7, kind: input, shape index: {}]   ;;  %s3713_s8 = inlined_call_operand.hbm [shape: bf16[1,128], index: 8, kind: input, shape index: {}]   ;;  %s3714_s9 = inlined_call_operand.hbm [shape: bf16[128,128], index: 9, kind: input, shape index: {}]   ;;  %s3715_s10 = inlined_call_operand.hbm [shape: bf16[128,128], index: 10, kind: input, shape index: {}]   ;;  %s3716_s11 = inlined_call_operand.hbm [shape: bf16[1,128], index: 11, kind: input, shape index: {}]   ;;  %s3717_s12 = inlined_call_operand.vmem [shape: bf16[128,32], index: 12, kind: input, shape index: {}]   ;;  %s3718_s13 = inlined_call_operand.hbm [shape: bf16[1,32], index: 13, kind: input, shape index: {}]   ;;  %s3719_s14 = inlined_call_operand.hbm [shape: bf16[1,32], index: 14, kind: input, shape index: {}]   ;;  %s3720_s15 = inlined_call_operand.hbm [shape: bf16[1,32], index: 15, kind: input, shape index: {}]   ;;  %s3721_s16 = inlined_call_operand.hbm [shape: bf16[32,128], index: 16, kind: input, shape index: {}]   ;;  %s3722_s17 = inlined_call_operand.hbm [shape: bf16[1,128], index: 17, kind: input, shape index: {}]   ;;  %s3723_s18 = inlined_call_operand.vmem [shape: bf16[16,128], index: 18, kind: output, shape index: {}]  }
   0x1   :  { %3726 = sst [smem:[#allocation29_spill]] %s3705_s0 }
   0x2   :  { %3727 = sst [smem:[#allocation30_spill]] %s3706_s1 }
   0x3   :  { %3728 = sst [smem:[#allocation31_spill]] %s3707_s2 }
   0x4   :  { %23 = vsyncpa [#allocation3], 0 }
   0x5   :  { %24 = vsyncpa [#allocation5], 0 }
   0x6   :  { %25 = vsyncpa [#allocation8], 0 }
   0x7   :  { %26 = vsyncpa [#allocation11], 0 }
   0x8   :  { %27 = vsyncpa [#allocation14], 0 }
   0x9   :  { %28 = vsyncpa [#allocation17], 0 }
   0xa   :  { %29 = vsyncpa [#allocation20], 0  ;;  %s2835_s27 = smov [#allocation4]   ;;  %s2836_s29 = smov [#allocation7]  }
   0xb   :  { %s50_s28 = sshll.u32 %s2835_s27, 4  ;;  %s70_s30 = sshll.u32 %s2836_s29, 4  ;;  %s51_s28 = int_to_ptr.vmem [resolvable:$true] %s50_s28  ;;  %s71_s30 = int_to_ptr.vmem [resolvable:$true] %s70_s30 }
   0xc   :  { %s2535_s1 = scalar_lea.hbm %s3708_s3, 16 }
   0xd   :  { %p2536_p0 = scmp.ne.s32.totalorder %s3708_s3, %s2535_s1  ;;  %p2539_p1 = scmp.lt.u32.totalorder %s2535_s1, %s3708_s3 }
   0xf   :  { %p2541_p2 = pnand %p2539_p1, %p2536_p0 }
  0x11   :  { %2544 = shalt.err (!%p2541_p2)
}
  0x12   :  { %s2545_s23 = scalar_lea.vmem %s51_s28, 16  ;;  %s2549_s24 = scalar_lea.vmem %s51_s28, 32 }
  0x13   :  { %p2546_p3 = scmp.ne.s32.totalorder %s51_s28, %s2545_s23  ;;  %p2550_p4 = scmp.lt.s32.totalorder %s51_s28, %s51_s28 }
  0x14   :  { %p2551_p5 = scmp.lt.s32.totalorder %s2549_s24, %s2545_s23 }
  0x16   :  { %p2552_p6 = por %p2551_p5, %p2550_p4 }
  0x18   :  { %p2553_p7 = pnand %p2552_p6, %p2546_p3 }
  0x1a   :  { %2556 = shalt.err (!%p2553_p7)
}
  0x1b   :  { %53 = dma.hbm_to_vmem [thread:$0]  %s3708_s3, 16, %s51_s28, [#allocation5]  }
  0x1c   :  { %s2557_s0 = scalar_lea.hbm %s3710_s5, 64 }
  0x1d   :  { %p2558_p8 = scmp.ne.s32.totalorder %s3710_s5, %s2557_s0  ;;  %p2561_p9 = scmp.lt.u32.totalorder %s2557_s0, %s3710_s5 }
  0x1f   :  { %p2563_p10 = pnand %p2561_p9, %p2558_p8 }
  0x21   :  { %2566 = shalt.err (!%p2563_p10)
}
  0x22   :  { %s2567_s22 = scalar_lea.vmem %s71_s30, 64  ;;  %p2572_p12 = scmp.lt.s32.totalorder %s71_s30, %s71_s30 }
  0x23   :  { %p2568_p11 = scmp.ne.s32.totalorder %s71_s30, %s2567_s22  ;;  %p2573_p13 = scmp.lt.s32.totalorder %s2567_s22, %s2567_s22 }
  0x25   :  { %p2574_p0 = por %p2573_p13, %p2572_p12 }
  0x27   :  { %p2575_p1 = pnand %p2574_p0, %p2568_p11 }
  0x29   :  { %2578 = shalt.err (!%p2575_p1)
}
  0x2a   :  { %73 = dma.hbm_to_vmem [thread:$0]  %s3710_s5, 64, %s71_s30, [#allocation8]  }
  0x2b   :  { %s2837_s2 = smov [#allocation10]   ;;  %s2579_s26 = scalar_lea.hbm %s3714_s9, 1024 }
  0x2c   :  { %s93_s23 = sshll.u32 %s2837_s2, 4  ;;  %p2580_p2 = scmp.ne.s32.totalorder %s3714_s9, %s2579_s26  ;;  %s94_s23 = int_to_ptr.vmem [resolvable:$true] %s93_s23 }
  0x2d   :  { %p2583_p3 = scmp.lt.u32.totalorder %s2579_s26, %s3714_s9 }
  0x2f   :  { %p2585_p4 = pnand %p2583_p3, %p2580_p2 }
  0x31   :  { %2588 = shalt.err (!%p2585_p4)
}
  0x32   :  { %s2589_s1 = scalar_lea.vmem %s94_s23, 1024  ;;  %p2594_p6 = scmp.lt.s32.totalorder %s94_s23, %s94_s23 }
  0x33   :  { %p2590_p5 = scmp.ne.s32.totalorder %s94_s23, %s2589_s1  ;;  %p2595_p7 = scmp.lt.s32.totalorder %s2589_s1, %s2589_s1 }
  0x35   :  { %p2596_p8 = por %p2595_p7, %p2594_p6 }
  0x37   :  { %p2597_p9 = pnand %p2596_p8, %p2590_p5 }
  0x39   :  { %2600 = shalt.err (!%p2597_p9)
}
  0x3a   :  { %s2838_s5 = smov 64   ;;  %s2839_s30 = smov 4  }
  0x3b   :  { %99 = dma.hbm_to_vmem [thread:$0]  %s3714_s9, 1024, %s94_s23, [#allocation11], %s2838_s5, %s2838_s5, %s2839_s30  }
  0x3c   :  { %s2840_s22 = smov [#allocation13]   ;;  %s2841_s28 = smov [#allocation16]  }
  0x3d   :  { %s118_s3 = sshll.u32 %s2840_s22, 4  ;;  %s140_s2 = sshll.u32 %s2841_s28, 4  ;;  %s119_s3 = int_to_ptr.vmem [resolvable:$true] %s118_s3  ;;  %s141_s2 = int_to_ptr.vmem [resolvable:$true] %s140_s2 }
  0x3e   :  { %s2601_s26 = scalar_lea.hbm %s3716_s11, 16 }
  0x3f   :  { %p2602_p10 = scmp.ne.s32.totalorder %s3716_s11, %s2601_s26  ;;  %p2605_p11 = scmp.lt.u32.totalorder %s2601_s26, %s3716_s11 }
  0x41   :  { %p2607_p12 = pnand %p2605_p11, %p2602_p10 }
  0x43   :  { %2610 = shalt.err (!%p2607_p12)
}
  0x44   :  { %s2611_s9 = scalar_lea.vmem %s119_s3, 16  ;;  %s2615_s23 = scalar_lea.vmem %s119_s3, 32 }
  0x45   :  { %p2612_p13 = scmp.ne.s32.totalorder %s119_s3, %s2611_s9  ;;  %p2616_p0 = scmp.lt.s32.totalorder %s119_s3, %s119_s3 }
  0x46   :  { %p2617_p1 = scmp.lt.s32.totalorder %s2615_s23, %s2611_s9 }
  0x48   :  { %p2618_p2 = por %p2617_p1, %p2616_p0 }
  0x4a   :  { %p2619_p3 = pnand %p2618_p2, %p2612_p13 }
  0x4c   :  { %2622 = shalt.err (!%p2619_p3)
}
  0x4d   :  { %121 = dma.hbm_to_vmem [thread:$0]  %s3716_s11, 16, %s119_s3, [#allocation14]  }
  0x4e   :  { %s2623_s28 = scalar_lea.hbm %s3719_s14, 16 }
  0x4f   :  { %p2624_p4 = scmp.ne.s32.totalorder %s3719_s14, %s2623_s28  ;;  %p2627_p5 = scmp.lt.u32.totalorder %s2623_s28, %s3719_s14 }
  0x51   :  { %p2629_p6 = pnand %p2627_p5, %p2624_p4 }
  0x53   :  { %2632 = shalt.err (!%p2629_p6)
}
  0x54   :  { %s2633_s29 = scalar_lea.vmem %s141_s2, 16  ;;  %s2637_s0 = scalar_lea.vmem %s141_s2, 32 }
  0x55   :  { %p2634_p7 = scmp.ne.s32.totalorder %s141_s2, %s2633_s29  ;;  %p2638_p8 = scmp.lt.s32.totalorder %s141_s2, %s141_s2 }
  0x56   :  { %p2639_p9 = scmp.lt.s32.totalorder %s2637_s0, %s2633_s29 }
  0x58   :  { %p2640_p10 = por %p2639_p9, %p2638_p8 }
  0x5a   :  { %p2641_p11 = pnand %p2640_p10, %p2634_p7 }
  0x5c   :  { %2644 = shalt.err (!%p2641_p11)
}
  0x5d   :  { %143 = dma.hbm_to_vmem [thread:$0]  %s3719_s14, 16, %s141_s2, [#allocation17]  }
  0x5e   :  { %s2842_s19 = smov [#allocation19]   ;;  %s2843_s23 = smov [#allocation2]  }
  0x5f   :  { %s159_s9 = sshll.u32 %s2842_s19, 4  ;;  %s40_s1 = sshll.u32 %s2843_s23, 4  ;;  %s160_s9 = int_to_ptr.vmem [resolvable:$true] %s159_s9  ;;  %s41_s1 = int_to_ptr.vmem [resolvable:$true] %s40_s1 }
  0x60   :  { %s2645_s22 = scalar_lea.hbm %s3721_s16, 256 }
  0x61   :  { %p2646_p12 = scmp.ne.s32.totalorder %s3721_s16, %s2645_s22  ;;  %p2649_p13 = scmp.lt.u32.totalorder %s2645_s22, %s3721_s16 }
  0x63   :  { %p2651_p0 = pnand %p2649_p13, %p2646_p12 }
  0x65   :  { %2654 = shalt.err (!%p2651_p0)
}
  0x66   :  { %s2655_s14 = scalar_lea.vmem %s160_s9, 256  ;;  %p2660_p2 = scmp.lt.s32.totalorder %s160_s9, %s160_s9 }
  0x67   :  { %p2656_p1 = scmp.ne.s32.totalorder %s160_s9, %s2655_s14  ;;  %p2661_p3 = scmp.lt.s32.totalorder %s2655_s14, %s2655_s14 }
  0x69   :  { %p2662_p4 = por %p2661_p3, %p2660_p2 }
  0x6b   :  { %p2663_p5 = pnand %p2662_p4, %p2656_p1 }
  0x6d   :  { %2666 = shalt.err (!%p2663_p5)
}
  0x6e   :  { %165 = dma.hbm_to_vmem [thread:$0]  %s3721_s16, 256, %s160_s9, [#allocation20], %s2838_s5, %s2838_s5, %s2839_s30  }
  0x6f   :  { %s3729_s11 = sld [smem:[#allocation31_spill]] }
  0x75   :  { %s2667_s3 = scalar_lea.hbm %s3729_s11, 16 }
  0x76   :  { %p2668_p6 = scmp.ne.s32.totalorder %s3729_s11, %s2667_s3  ;;  %p2671_p7 = scmp.lt.u32.totalorder %s2667_s3, %s3729_s11 }
  0x78   :  { %p2673_p8 = pnand %p2671_p7, %p2668_p6 }
  0x7a   :  { %2676 = shalt.err (!%p2673_p8)
}
  0x7b   :  { %s2677_s22 = scalar_lea.vmem %s41_s1, 16  ;;  %s2681_s28 = scalar_lea.vmem %s41_s1, 32 }
  0x7c   :  { %p2678_p9 = scmp.ne.s32.totalorder %s41_s1, %s2677_s22  ;;  %p2682_p10 = scmp.lt.s32.totalorder %s41_s1, %s41_s1 }
  0x7d   :  { %p2683_p11 = scmp.lt.s32.totalorder %s2681_s28, %s2677_s22 }
  0x7f   :  { %p2684_p12 = por %p2683_p11, %p2682_p10 }
  0x81   :  { %p2685_p13 = pnand %p2684_p12, %p2678_p9 }
  0x83   :  { %2688 = shalt.err (!%p2685_p13)
}
  0x84   :  { %43 = dma.hbm_to_vmem [thread:$0]  %s3729_s11, 16, %s41_s1, [#allocation3]  }
  0x85   :  { %s2844_s24 = smov [#allocation6]   ;;  %s2845_s26 = smov [#allocation9]  }
  0x86   :  { %s60_s25 = sshll.u32 %s2844_s24, 4  ;;  %s84_s14 = sshll.u32 %s2845_s26, 4  ;;  %s61_s25 = int_to_ptr.vmem [resolvable:$true] %s60_s25  ;;  %s85_s14 = int_to_ptr.vmem [resolvable:$true] %s84_s14 }
  0x87   :  { %s2689_s29 = scalar_lea.hbm %s3709_s4, 16 }
  0x88   :  { %p2690_p0 = scmp.ne.s32.totalorder %s3709_s4, %s2689_s29  ;;  %p2693_p1 = scmp.lt.u32.totalorder %s2689_s29, %s3709_s4 }
  0x8a   :  { %p2695_p2 = pnand %p2693_p1, %p2690_p0 }
  0x8c   :  { %2698 = shalt.err (!%p2695_p2)
}
  0x8d   :  { %s2699_s1 = scalar_lea.vmem %s61_s25, 16  ;;  %s2703_s11 = scalar_lea.vmem %s61_s25, 32 }
  0x8e   :  { %p2700_p3 = scmp.ne.s32.totalorder %s61_s25, %s2699_s1  ;;  %p2704_p4 = scmp.lt.s32.totalorder %s61_s25, %s61_s25 }
  0x8f   :  { %p2705_p5 = scmp.lt.s32.totalorder %s2703_s11, %s2699_s1 }
  0x91   :  { %p2706_p6 = por %p2705_p5, %p2704_p4 }
  0x93   :  { %p2707_p7 = pnand %p2706_p6, %p2700_p3 }
  0x95   :  { %2710 = shalt.err (!%p2707_p7)
}
  0x96   :  { %63 = dma.hbm_to_vmem [thread:$0]  %s3709_s4, 16, %s61_s25, [#allocation5]  }
  0x97   :  { %s2711_s16 = scalar_lea.hbm %s3713_s8, 16 }
  0x98   :  { %p2712_p8 = scmp.ne.s32.totalorder %s3713_s8, %s2711_s16  ;;  %p2715_p9 = scmp.lt.u32.totalorder %s2711_s16, %s3713_s8 }
  0x9a   :  { %p2717_p10 = pnand %p2715_p9, %p2712_p8 }
  0x9c   :  { %2720 = shalt.err (!%p2717_p10)
}
  0x9d   :  { %s2721_s27 = scalar_lea.vmem %s85_s14, 16  ;;  %s2725_s29 = scalar_lea.vmem %s85_s14, 32 }
  0x9e   :  { %p2722_p11 = scmp.ne.s32.totalorder %s85_s14, %s2721_s27  ;;  %p2726_p12 = scmp.lt.s32.totalorder %s85_s14, %s85_s14 }
  0x9f   :  { %p2727_p13 = scmp.lt.s32.totalorder %s2725_s29, %s2721_s27 }
  0xa1   :  { %p2728_p0 = por %p2727_p13, %p2726_p12 }
  0xa3   :  { %p2729_p1 = pnand %p2728_p0, %p2722_p11 }
  0xa5   :  { %2732 = shalt.err (!%p2729_p1)
}
  0xa6   :  { %87 = dma.hbm_to_vmem [thread:$0]  %s3713_s8, 16, %s85_s14, [#allocation8]  }
  0xa7   :  { %s2846_s0 = smov [#allocation12]   ;;  %s2847_s19 = smov [#allocation15]  }
  0xa8   :  { %s105_s3 = sshll.u32 %s2846_s0, 4  ;;  %s130_s23 = sshll.u32 %s2847_s19, 4  ;;  %s106_s3 = int_to_ptr.vmem [resolvable:$true] %s105_s3  ;;  %s131_s23 = int_to_ptr.vmem [resolvable:$true] %s130_s23 }
  0xa9   :  { %s2733_s20 = scalar_lea.hbm %s3715_s10, 1024 }
  0xaa   :  { %p2734_p2 = scmp.ne.s32.totalorder %s3715_s10, %s2733_s20  ;;  %p2737_p3 = scmp.lt.u32.totalorder %s2733_s20, %s3715_s10 }
  0xac   :  { %p2739_p4 = pnand %p2737_p3, %p2734_p2 }
  0xae   :  { %2742 = shalt.err (!%p2739_p4)
}
  0xaf   :  { %s2743_s8 = scalar_lea.vmem %s106_s3, 1024  ;;  %p2748_p6 = scmp.lt.s32.totalorder %s106_s3, %s106_s3 }
  0xb0   :  { %p2744_p5 = scmp.ne.s32.totalorder %s106_s3, %s2743_s8  ;;  %p2749_p7 = scmp.lt.s32.totalorder %s2743_s8, %s2743_s8 }
  0xb2   :  { %p2750_p8 = por %p2749_p7, %p2748_p6 }
  0xb4   :  { %p2751_p9 = pnand %p2750_p8, %p2744_p5 }
  0xb6   :  { %2754 = shalt.err (!%p2751_p9)
}
  0xb7   :  { %111 = dma.hbm_to_vmem [thread:$0]  %s3715_s10, 1024, %s106_s3, [#allocation11], %s2838_s5, %s2838_s5, %s2839_s30  }
  0xb8   :  { %s2755_s2 = scalar_lea.hbm %s3718_s13, 16 }
  0xb9   :  { %p2756_p10 = scmp.ne.s32.totalorder %s3718_s13, %s2755_s2  ;;  %p2759_p11 = scmp.lt.u32.totalorder %s2755_s2, %s3718_s13 }
  0xbb   :  { %p2761_p12 = pnand %p2759_p11, %p2756_p10 }
  0xbd   :  { %2764 = shalt.err (!%p2761_p12)
}
  0xbe   :  { %s2765_s0 = scalar_lea.vmem %s131_s23, 16  ;;  %s2769_s19 = scalar_lea.vmem %s131_s23, 32 }
  0xbf   :  { %p2766_p13 = scmp.ne.s32.totalorder %s131_s23, %s2765_s0  ;;  %p2770_p0 = scmp.lt.s32.totalorder %s131_s23, %s131_s23 }
  0xc0   :  { %p2771_p1 = scmp.lt.s32.totalorder %s2769_s19, %s2765_s0 }
  0xc2   :  { %p2772_p2 = por %p2771_p1, %p2770_p0 }
  0xc4   :  { %p2773_p3 = pnand %p2772_p2, %p2766_p13 }
  0xc6   :  { %2776 = shalt.err (!%p2773_p3)
}
  0xc7   :  { %133 = dma.hbm_to_vmem [thread:$0]  %s3718_s13, 16, %s131_s23, [#allocation14]  }
  0xc8   :  { %s2848_s3 = smov [#allocation18]   ;;  %s2849_s11 = smov [#allocation21]  }
  0xc9   :  { %s150_s1 = sshll.u32 %s2848_s3, 4  ;;  %s172_s20 = sshll.u32 %s2849_s11, 4  ;;  %s151_s1 = int_to_ptr.vmem [resolvable:$true] %s150_s1  ;;  %s173_s20 = int_to_ptr.vmem [resolvable:$true] %s172_s20 }
  0xca   :  { %s2777_s28 = scalar_lea.hbm %s3720_s15, 16 }
  0xcb   :  { %p2778_p4 = scmp.ne.s32.totalorder %s3720_s15, %s2777_s28  ;;  %p2781_p5 = scmp.lt.u32.totalorder %s2777_s28, %s3720_s15 }
  0xcd   :  { %p2783_p6 = pnand %p2781_p5, %p2778_p4 }
  0xcf   :  { %2786 = shalt.err (!%p2783_p6)
}
  0xd0   :  { %s2787_s13 = scalar_lea.vmem %s151_s1, 16  ;;  %s2791_s23 = scalar_lea.vmem %s151_s1, 32 }
  0xd1   :  { %p2788_p7 = scmp.ne.s32.totalorder %s151_s1, %s2787_s13  ;;  %p2792_p8 = scmp.lt.s32.totalorder %s151_s1, %s151_s1 }
  0xd2   :  { %p2793_p9 = scmp.lt.s32.totalorder %s2791_s23, %s2787_s13 }
  0xd4   :  { %p2794_p10 = por %p2793_p9, %p2792_p8 }
  0xd6   :  { %p2795_p11 = pnand %p2794_p10, %p2788_p7 }
  0xd8   :  { %2798 = shalt.err (!%p2795_p11)
}
  0xd9   :  { %153 = dma.hbm_to_vmem [thread:$0]  %s3720_s15, 16, %s151_s1, [#allocation17]  }
  0xda   :  { %s2799_s29 = scalar_lea.hbm %s3722_s17, 16 }
  0xdb   :  { %p2800_p12 = scmp.ne.s32.totalorder %s3722_s17, %s2799_s29  ;;  %p2803_p13 = scmp.lt.u32.totalorder %s2799_s29, %s3722_s17 }
  0xdd   :  { %p2805_p0 = pnand %p2803_p13, %p2800_p12 }
  0xdf   :  { %2808 = shalt.err (!%p2805_p0)
}
  0xe0   :  { %s2809_s10 = scalar_lea.vmem %s173_s20, 16  ;;  %s2813_s30 = scalar_lea.vmem %s173_s20, 32 }
  0xe1   :  { %p2810_p1 = scmp.ne.s32.totalorder %s173_s20, %s2809_s10  ;;  %p2814_p2 = scmp.lt.s32.totalorder %s173_s20, %s173_s20 }
  0xe2   :  { %p2815_p3 = scmp.lt.s32.totalorder %s2813_s30, %s2809_s10 }
  0xe4   :  { %p2816_p4 = por %p2815_p3, %p2814_p2 }
  0xe6   :  { %p2817_p5 = pnand %p2816_p4, %p2810_p1 }
  0xe8   :  { %2820 = shalt.err (!%p2817_p5)
}
  0xe9   :  { %175 = dma.hbm_to_vmem [thread:$0]  %s3722_s17, 16, %s173_s20, [#allocation20]  }
  0xea   :  { %2821 = dma.done.wait [#allocation3], 16  }
  0xeb   :  { %2822 = vsyncadd [#allocation3], 4294967280 }
  0xec   :  { %2823 = dma.done.wait [#allocation5], 32  }
  0xed   :  { %2824 = vsyncadd [#allocation5], 4294967264 }
  0xee   :  { %2825 = dma.done.wait [#allocation8], 80  }
  0xef   :  { %2826 = vsyncadd [#allocation8], 4294967216 }
  0xf0   :  { %2827 = dma.done.wait [#allocation11], 2048  }
  0xf1   :  { %2828 = vsyncadd [#allocation11], 4294965248 }
  0xf2   :  { %2829 = dma.done.wait [#allocation14], 32  }
  0xf3   :  { %2830 = vsyncadd [#allocation14], 4294967264 }
  0xf4   :  { %2831 = dma.done.wait [#allocation17], 32  }
  0xf5   :  { %2832 = vsyncadd [#allocation17], 4294967264 }
  0xf6   :  { %2833 = dma.done.wait [#allocation20], 272  }
  0xf7   :  { %2834 = vsyncadd [#allocation20], 4294967024  ;;  %v2850_v0 = vmov 0.0   ;;  %vm2851_vm0 = vmmov 0   ;;  %s3730_s11 = sld [smem:[#allocation30_spill]]  ;;  %vm239_vm1 = vcmask 261120   ;;  %v223_v4 = vlaneseq }
  0xf8   :  { %2084 = vmatprep.subr.bf16.mxu0 %v2850_v0  ;;  %2088 = vmatprep.mubr.msk.bf16.mxu0 %vm2851_vm0, %v2850_v0  ;;  %s3731_s16 = sld [smem:[#allocation29_spill]]  ;;  %v221_v6 = vld [vmem:[#allocation2] sm:$0x1]  ;;  %vm287_vm2 = vcmask 517120   ;;  %v2492_v22 = vld [vmem:[%s3711_s6 + $0x8] sm:$0xff]   ;;  %v2493_v23 = vld [vmem:[%s3711_s6 + $0x10] sm:$0xff]  }
  0xf9   :  { %2092 = vmatprep.subr.bf16.mxu1 %v2850_v0  ;;  %2100 = vmatprep.mubr.msk.bf16.mxu1 %vm2851_vm0, %v2850_v0  ;;  %v3132_v5 = vshrl.u32 %v223_v4, 7  ;;  %v222_v7 = vunpack.c.l.bf16 %v221_v6  ;;  %v2491_v21 = vld [vmem:[%s3711_s6] sm:$0xff]   ;;  %v2494_v24 = vld [vmem:[%s3711_s6 + $0x18] sm:$0xff]   ;;  %v3163_v26 = vld [vmem:[%s3712_s7 + $0x8] sm:$0xff]   ;;  %vm375_vm3 = vcmask 1040384   ;;  %vm379_vm4 = vcmask 1041408  }
  0xfa   :  { %2093 = vmatpush3.bf16.msra.mxu1 %v2491_v21  ;;  %v3157_v25 = vld [vmem:[%s3712_s7] sm:$0xff]   ;;  %v3170_v27 = vld [vmem:[%s3712_s7 + $0x10] sm:$0xff]   ;;  %v3177_v28 = vld [vmem:[%s3712_s7 + $0x18] sm:$0xff]   ;;  %vm382_vm5 = vcmask 1042432   ;;  %vm385_vm6 = vcmask 1043456   ;;  %vm388_vm7 = vcmask 1044480  }
  0xfb   :  { %v3135_v8 = vsub.s32 0, %v3132_v5  ;;  %2094 = vmatprep.subr.bf16.mxu1 %v2850_v0  ;;  %v3184_v29 = vld [vmem:[%s3712_s7 + $0x20] sm:$0xff]   ;;  %v3191_v30 = vld [vmem:[%s3712_s7 + $0x28] sm:$0xff]   ;;  %v3198_v31 = vld [vmem:[%s3712_s7 + $0x30] sm:$0xff]   ;;  %v333_v49 = vsub.s32 1, %v3132_v5  ;;  %v343_v50 = vsub.s32 2, %v3132_v5 }
  0xfc   :  { %v3205_v32 = vld [vmem:[%s3712_s7 + $0x38] sm:$0xff]   ;;  %v283_v36 = vld [vmem:[#allocation4] sm:$0x1]  ;;  %v285_v37 = vld [vmem:[#allocation6] sm:$0x1]  ;;  %v353_v52 = vsub.s32 3, %v3132_v5 }
  0xfd   :  { %v2489_v1 = vld [vmem:[%s3730_s11] sm:$0xff]   ;;  %v2490_v2 = vld [vmem:[%s3730_s11 + $0x8] sm:$0xff]   ;;  %v226_v9 = vrot.slane %v222_v7, %v3135_v8  ;;  %v284_v38 = vunpack.c.l.bf16 %v283_v36  ;;  %v286_v40 = vunpack.c.l.bf16 %v285_v37  ;;  %vm391_vm8 = vcmask 1045504  }
  0xfe   :  { %2085 = vmatpush3.bf16.msra.mxu0 %v2489_v1  ;;  %v216_v3 = vld [vmem:[%s3731_s16] sm:$0x1]  ;;  %2095 = vmatpush3.bf16.msra.mxu1 %v2492_v22  ;;  %v314_v39 = vld [vmem:[#allocation7] sm:$0xf]  ;;  %vm394_vm9 = vcmask 1046528   ;;  %vm400_vm10 = vcmask 523264  }
  0xff   :  { %2086 = vmatprep.subr.bf16.mxu0 %v2850_v0  ;;  %2096 = vmatprep.subr.bf16.mxu1 %v2850_v0  ;;  %v305_v41 = vrot.slane %v284_v38, %v3135_v8  ;;  %v323_v42 = vshrl.u32 %v314_v39, 16  ;;  %v310_v44 = vrot.slane %v286_v40, %v3135_v8  ;;  %v316_v47 = vpack.i.b16 %v314_v39, %v314_v39 }
 0x101   :  { %v324_v48 = vpack.i.b16 %v323_v42, %v323_v42  ;;  %v334_v55 = vrot.slane %v316_v47, %v333_v49  ;;  %v344_v57 = vrot.slane %v316_v47, %v343_v50  ;;  %v321_v59 = vrot.slane %v316_v47, %v3135_v8 }
 0x102   :  { %2087 = vmatpush3.bf16.msra.mxu0 %v2490_v2  ;;  %2097 = vmatpush3.bf16.msra.mxu1 %v2493_v23  ;;  %v354_v61 = vrot.slane %v316_v47, %v353_v52 }
 0x103   :  { %2104 = vmatprep.subr.bf16.mxu0 %v2850_v0  ;;  %2098 = vmatprep.subr.bf16.mxu1 %v2850_v0  ;;  %v329_v54 = vrot.slane %v324_v48, %v3135_v8  ;;  %v339_v56 = vrot.slane %v324_v48, %v333_v49  ;;  %v349_v60 = vrot.slane %v324_v48, %v343_v50 }
 0x104   :  { %v359_v2 = vrot.slane %v324_v48, %v353_v52 }
 0x105   :  { %2089 = vmatmul.mubr.msk.bf16.vlgmr.msra.gmra.mrb[0].mxu0 %vm239_vm1, %v216_v3 }
 0x106   :  { %2120 = vmatprep.mubr.msk.bf16.mxu0 %vm2851_vm0, %v2850_v0  ;;  %2099 = vmatpush3.bf16.msra.mxu1 %v2494_v24 }
 0x107   :  { %2124 = vmatprep.subr.bf16.mxu1 %v2850_v0  ;;  %2105 = vmatpush3.bf16.msra.mxu0 %v3157_v25 }
 0x108   :  { %2106 = vmatprep.subr.bf16.mxu0 %v2850_v0 }
 0x10b   :  { %2107 = vmatpush3.bf16.msra.mxu0 %v3163_v26 }
 0x10c   :  { %2108 = vmatprep.subr.bf16.mxu0 %v2850_v0 }
 0x10f   :  { %2109 = vmatpush3.bf16.msra.mxu0 %v3170_v27 }
 0x110   :  { %2110 = vmatprep.subr.bf16.mxu0 %v2850_v0 }
 0x113   :  { %2111 = vmatpush3.bf16.msra.mxu0 %v3177_v28 }
 0x114   :  { %2112 = vmatprep.subr.bf16.mxu0 %v2850_v0 }
 0x117   :  { %2113 = vmatpush3.bf16.msra.mxu0 %v3184_v29 }
 0x118   :  { %2114 = vmatprep.subr.bf16.mxu0 %v2850_v0 }
 0x11b   :  { %2115 = vmatpush3.bf16.msra.mxu0 %v3191_v30 }
 0x11c   :  { %2116 = vmatprep.subr.bf16.mxu0 %v2850_v0 }
 0x11f   :  { %2117 = vmatpush3.bf16.msra.mxu0 %v3198_v31 }
 0x120   :  { %2118 = vmatprep.subr.bf16.mxu0 %v2850_v0 }
 0x123   :  { %2119 = vmatpush3.bf16.msra.mxu0 %v3205_v32 }
 0x124   :  { %2144 = vmatprep.subr.bf16.mxu0 %v2850_v0 }
 0x1d8   :  { %v277_v10 = vpop.f32.mrb[0].mxu0 }
 0x1d9   :  { %v278_v11 = vadd.f32 %v277_v10, %v226_v9  ;;  %v2090_v12 = vpop.f32.mrb[1].mxu0 }
 0x1da   :  { %v280_v13 = vpop.f32.mrb[2].mxu0 }
 0x1db   :  { %v2091_v14 = vpop.f32.mrb[3].mxu0  ;;  %v288_v15 = vsel %vm287_vm2, %v278_v11, 0.0 }
 0x1dc   :  { %289 = vadd.xlane.f32.xlu0 %v288_v15 }
 0x269   :  { %v290_v16 = vpop.xlane.xlu0 %289 }
 0x26a   :  { %v292_v17 = vmul.f32 0.015625, %v290_v16 }
 0x26c   :  { %v293_v18 = vsub.f32 %v278_v11, %v292_v17 }
 0x26e   :  { %v294_v19 = vmul.f32 %v293_v18, %v293_v18 }
 0x270   :  { %v295_v20 = vsel %vm287_vm2, %v294_v19, 0.0 }
 0x271   :  { %296 = vadd.xlane.f32.xlu0 %v295_v20 }
 0x2fe   :  { %v297_v33 = vpop.xlane.xlu0 %296 }
 0x2ff   :  { %v298_v34 = vmul.f32 0.015625, %v297_v33  ;;  %v429_v33 = vld [vmem:[#allocation9] sm:$0x1] }
 0x301   :  { %v299_v35 = vadd.f32 1e-05, %v298_v34  ;;  %v430_v34 = vunpack.c.l.bf16 %v429_v33 }
 0x303   :  { %2529 = vrsqrt.f32 %v299_v35  ;;  %v434_v35 = vrot.slane %v430_v34, %v3135_v8 }
 0x30d   :  { %v2530_v43 = vpop.eup %2529 }
 0x30e   :  { %v301_v45 = vmul.f32 %v2530_v43, %v293_v18 }
 0x310   :  { %v306_v46 = vmul.f32 %v305_v41, %v301_v45 }
 0x312   :  { %v311_v51 = vadd.f32 %v310_v44, %v306_v46 }
 0x314   :  { %v312_v53 = vmax.f32 %v311_v51, 0.0 }
 0x316   :  { %v313_v58 = vpack.c.bf16 %v312_v53, %v312_v53 }
 0x318   :  { %398 = vrot.lane.b32.xlu1 %v313_v58, %s2838_s5  ;;  %v330_v62 = vadd.bf16 %v329_v54, %v313_v58  ;;  %v335_v63 = vadd.bf16 %v334_v55, %v313_v58  ;;  %v340_v1 = vadd.bf16 %v339_v56, %v313_v58  ;;  %v345_v3 = vadd.bf16 %v344_v57, %v313_v58 }
 0x319   :  { %v322_v4 = vadd.bf16 %v321_v59, %v313_v58  ;;  %v350_v5 = vadd.bf16 %v349_v60, %v313_v58  ;;  %v355_v9 = vadd.bf16 %v354_v61, %v313_v58  ;;  %v360_v10 = vadd.bf16 %v359_v2, %v313_v58 }
 0x31a   :  { %v362_v6 = vrot.slane %v330_v62, 7  ;;  %v364_v7 = vrot.slane %v335_v63, 6  ;;  %v366_v11 = vrot.slane %v340_v1, 5  ;;  %v368_v13 = vrot.slane %v345_v3, 4 }
 0x31b   :  { %v370_v15 = vrot.slane %v350_v5, 3  ;;  %v372_v17 = vrot.slane %v355_v9, 2  ;;  %v374_v19 = vrot.slane %v360_v10, 1 }
 0x31c   :  { %v378_v12 = vsel %vm375_vm3, %v322_v4, %v362_v6 }
 0x31d   :  { %v381_v14 = vsel %vm379_vm4, %v378_v12, %v364_v7 }
 0x31e   :  { %v384_v16 = vsel %vm382_vm5, %v381_v14, %v366_v11 }
 0x31f   :  { %v387_v18 = vsel %vm385_vm6, %v384_v16, %v368_v13 }
 0x320   :  { %v390_v20 = vsel %vm388_vm7, %v387_v18, %v370_v15 }
 0x321   :  { %v393_v21 = vsel %vm391_vm8, %v390_v20, %v372_v17 }
 0x322   :  { %v396_v22 = vsel %vm394_vm9, %v393_v21, %v374_v19 }
 0x323   :  { %2101 = vmatmul.mubr.msk.bf16.vlgmr.msra.gmra.mrb[0].mxu1 %vm400_vm10, %v396_v22 }
 0x324   :  { %2125 = vmatpush3.bf16.msra.mxu1 %v3157_v25  ;;  %2140 = vmatprep.mubr.msk.bf16.mxu1 %vm2851_vm0, %v2850_v0 }
 0x325   :  { %2126 = vmatprep.subr.bf16.mxu1 %v2850_v0 }
 0x328   :  { %2127 = vmatpush3.bf16.msra.mxu1 %v3163_v26 }
 0x329   :  { %2128 = vmatprep.subr.bf16.mxu1 %v2850_v0 }
 0x32c   :  { %2129 = vmatpush3.bf16.msra.mxu1 %v3170_v27 }
 0x32d   :  { %2130 = vmatprep.subr.bf16.mxu1 %v2850_v0 }
 0x330   :  { %2131 = vmatpush3.bf16.msra.mxu1 %v3177_v28 }
 0x331   :  { %2132 = vmatprep.subr.bf16.mxu1 %v2850_v0 }
 0x334   :  { %2133 = vmatpush3.bf16.msra.mxu1 %v3184_v29 }
 0x335   :  { %2134 = vmatprep.subr.bf16.mxu1 %v2850_v0 }
 0x338   :  { %2135 = vmatpush3.bf16.msra.mxu1 %v3191_v30 }
 0x339   :  { %2136 = vmatprep.subr.bf16.mxu1 %v2850_v0 }
 0x33c   :  { %2137 = vmatpush3.bf16.msra.mxu1 %v3198_v31 }
 0x33d   :  { %2138 = vmatprep.subr.bf16.mxu1 %v2850_v0 }
 0x340   :  { %2139 = vmatpush3.bf16.msra.mxu1 %v3205_v32 }
 0x341   :  { %2164 = vmatprep.subr.bf16.mxu1 %v2850_v0 }
 0x38a   :  { %v399_v23 = vpop.permute.xlu1 %398 }
 0x38b   :  { %v3245_v24 = vsel %vm400_vm10, %v313_v58, %v399_v23 }
 0x38c   :  { %2121 = vmatmul.mubr.bf16.vlgmr.msra.gmra.mrb[4].mxu0 %v3245_v24 }
 0x38d   :  { %2145 = vmatpush3.bf16.msra.mxu0 %v3157_v25  ;;  %2160 = vmatprep.mubr.msk.bf16.mxu0 %vm2851_vm0, %v2850_v0 }
 0x38e   :  { %2146 = vmatprep.subr.bf16.mxu0 %v2850_v0 }
 0x391   :  { %2147 = vmatpush3.bf16.msra.mxu0 %v3163_v26 }
 0x392   :  { %2148 = vmatprep.subr.bf16.mxu0 %v2850_v0 }
 0x395   :  { %2149 = vmatpush3.bf16.msra.mxu0 %v3170_v27 }
 0x396   :  { %2150 = vmatprep.subr.bf16.mxu0 %v2850_v0 }
 0x399   :  { %2151 = vmatpush3.bf16.msra.mxu0 %v3177_v28 }
 0x39a   :  { %2152 = vmatprep.subr.bf16.mxu0 %v2850_v0 }
 0x39d   :  { %2153 = vmatpush3.bf16.msra.mxu0 %v3184_v29 }
 0x39e   :  { %2154 = vmatprep.subr.bf16.mxu0 %v2850_v0 }
 0x3a1   :  { %2155 = vmatpush3.bf16.msra.mxu0 %v3191_v30 }
 0x3a2   :  { %2156 = vmatprep.subr.bf16.mxu0 %v2850_v0 }
 0x3a5   :  { %2157 = vmatpush3.bf16.msra.mxu0 %v3198_v31 }
 0x3a6   :  { %2158 = vmatprep.subr.bf16.mxu0 %v2850_v0 }
 0x3a9   :  { %2159 = vmatpush3.bf16.msra.mxu0 %v3205_v32 }
 0x3aa   :  { %2184 = vmatprep.subr.bf16.mxu0 %v2850_v0 }
 0x3f6   :  { %v495_v36 = vpop.f32.mrb[0].mxu1 }
 0x3f7   :  { %v496_v37 = vadd.f32 %v495_v36, %v434_v35  ;;  %v2102_v38 = vpop.f32.mrb[1].mxu1 }
 0x3f8   :  { %v498_v39 = vpop.f32.mrb[2].mxu1 }
 0x3f9   :  { %v499_v40 = vadd.f32 %v498_v39, %v434_v35  ;;  %v2103_v41 = vpop.f32.mrb[3].mxu1  ;;  %v745_v42 = vrot.slane %v496_v37, 6  ;;  %v794_v43 = vrot.slane %v496_v37, 2 }
 0x3fa   :  { %v2513_v41 = vld [vmem:[#allocation10 + $0x10] sm:$0xff]  }
 0x3fb   :  { %v503_v44 = vrot.slane %v499_v40, 6  ;;  %v597_v45 = vrot.slane %v499_v40, 2  ;;  %v3268_v46 = vsel %vm400_vm10, %v499_v40, %v745_v42  ;;  %v3271_v47 = vsel %vm400_vm10, %v499_v40, %v794_v43 }
 0x3fd   :  { %v505_v48 = vsel %vm400_vm10, %v496_v37, %v503_v44  ;;  %v3275_v49 = vsel %vm400_vm10, %v496_v37, %v597_v45 }
 0x45f   :  { %v588_v50 = vpop.f32.mrb[4].mxu0 }
 0x460   :  { %v594_v51 = vadd.f32 %v588_v50, %v505_v48  ;;  %v2122_v52 = vpop.f32.mrb[5].mxu0 }
 0x461   :  { %v591_v53 = vpop.f32.mrb[6].mxu0  ;;  %v3399_v52 = vld [vmem:[#allocation12] sm:$0xff]  }
 0x462   :  { %v595_v54 = vmax.f32 %v594_v51, 0.0  ;;  %v2123_v55 = vpop.f32.mrb[7].mxu0 }
 0x463   :  { %v3413_v55 = vld [vmem:[#allocation12 + $0x18] sm:$0xff]  }
 0x464   :  { %v3277_v56 = vpack.c.bf16 %v595_v54, %v595_v54  ;;  %v3403_v54 = vld [vmem:[#allocation12 + $0x8] sm:$0xff]  }
 0x466   :  { %2141 = vmatmul.mubr.bf16.vlgmr.msra.gmra.mrb[4].mxu1 %v3277_v56 }
 0x467   :  { %2165 = vmatpush3.bf16.msra.mxu1 %v3157_v25  ;;  %2180 = vmatprep.mubr.msk.bf16.mxu1 %vm2851_vm0, %v2850_v0 }
 0x468   :  { %2166 = vmatprep.subr.bf16.mxu1 %v2850_v0 }
 0x46b   :  { %2167 = vmatpush3.bf16.msra.mxu1 %v3163_v26 }
 0x46c   :  { %2168 = vmatprep.subr.bf16.mxu1 %v2850_v0 }
 0x46f   :  { %2169 = vmatpush3.bf16.msra.mxu1 %v3170_v27 }
 0x470   :  { %2170 = vmatprep.subr.bf16.mxu1 %v2850_v0 }
 0x473   :  { %2171 = vmatpush3.bf16.msra.mxu1 %v3177_v28 }
 0x474   :  { %2172 = vmatprep.subr.bf16.mxu1 %v2850_v0 }
 0x477   :  { %2173 = vmatpush3.bf16.msra.mxu1 %v3184_v29 }
 0x478   :  { %2174 = vmatprep.subr.bf16.mxu1 %v2850_v0 }
 0x47b   :  { %2175 = vmatpush3.bf16.msra.mxu1 %v3191_v30 }
 0x47c   :  { %2176 = vmatprep.subr.bf16.mxu1 %v2850_v0 }
 0x47f   :  { %2177 = vmatpush3.bf16.msra.mxu1 %v3198_v31 }
 0x480   :  { %2178 = vmatprep.subr.bf16.mxu1 %v2850_v0 }
 0x483   :  { %2179 = vmatpush3.bf16.msra.mxu1 %v3205_v32 }
 0x484   :  { %2204 = vmatprep.subr.bf16.mxu1 %v2850_v0 }
 0x539   :  { %v634_v57 = vpop.f32.mrb[4].mxu1 }
 0x53a   :  { %v641_v58 = vrot.slane %v634_v57, 6  ;;  %v2142_v59 = vpop.f32.mrb[5].mxu1  ;;  %v3417_v57 = vld [vmem:[#allocation12 + $0x20] sm:$0xff]  }
 0x53b   :  { %v637_v60 = vpop.f32.mrb[6].mxu1  ;;  %v3425_v59 = vld [vmem:[#allocation12 + $0x30] sm:$0xff]  }
 0x53c   :  { %v643_v61 = vadd.f32 %v641_v58, %v3275_v49  ;;  %v2143_v62 = vpop.f32.mrb[7].mxu1  ;;  %v3421_v58 = vld [vmem:[#allocation12 + $0x28] sm:$0xff]   ;;  %v3429_v60 = vld [vmem:[#allocation12 + $0x38] sm:$0xff]  }
 0x53d   :  { %v2516_v62 = vld [vmem:[#allocation10 + $0x28] sm:$0xff]  }
 0x53e   :  { %v644_v63 = vmax.f32 %v643_v61, 0.0  ;;  %v2515_v61 = vld [vmem:[#allocation10 + $0x20] sm:$0xff]  }
 0x540   :  { %v3299_v1 = vpack.c.bf16 %v644_v63, %v644_v63  ;;  %v2517_v63 = vld [vmem:[#allocation10 + $0x30] sm:$0xff]  }
 0x542   :  { %v647_v2 = vrot.slane %v3299_v1, 1 }
 0x544   :  { %2161 = vmatmul.mubr.bf16.vlgmr.msra.gmra.mrb[8].mxu0 %v647_v2  ;;  %v2518_v2 = vld [vmem:[#allocation10 + $0x38] sm:$0xff]  }
 0x545   :  { %2185 = vmatpush3.bf16.msra.mxu0 %v3157_v25  ;;  %2200 = vmatprep.mubr.msk.bf16.mxu0 %vm2851_vm0, %v2850_v0 }
 0x546   :  { %2186 = vmatprep.subr.bf16.mxu0 %v2850_v0 }
 0x549   :  { %2187 = vmatpush3.bf16.msra.mxu0 %v3163_v26 }
 0x54a   :  { %2188 = vmatprep.subr.bf16.mxu0 %v2850_v0 }
 0x54d   :  { %2189 = vmatpush3.bf16.msra.mxu0 %v3170_v27 }
 0x54e   :  { %2190 = vmatprep.subr.bf16.mxu0 %v2850_v0 }
 0x551   :  { %2191 = vmatpush3.bf16.msra.mxu0 %v3177_v28 }
 0x552   :  { %2192 = vmatprep.subr.bf16.mxu0 %v2850_v0 }
 0x555   :  { %2193 = vmatpush3.bf16.msra.mxu0 %v3184_v29 }
 0x556   :  { %2194 = vmatprep.subr.bf16.mxu0 %v2850_v0 }
 0x559   :  { %2195 = vmatpush3.bf16.msra.mxu0 %v3191_v30 }
 0x55a   :  { %2196 = vmatprep.subr.bf16.mxu0 %v2850_v0 }
 0x55d   :  { %2197 = vmatpush3.bf16.msra.mxu0 %v3198_v31 }
 0x55e   :  { %2198 = vmatprep.subr.bf16.mxu0 %v2850_v0 }
 0x561   :  { %2199 = vmatpush3.bf16.msra.mxu0 %v3205_v32 }
 0x562   :  { %2224 = vmatprep.subr.bf16.mxu0 %v2850_v0 }
 0x617   :  { %v683_v3 = vpop.f32.mrb[8].mxu0 }
 0x618   :  { %v690_v4 = vrot.slane %v683_v3, 4  ;;  %v2162_v5 = vpop.f32.mrb[9].mxu0 }
 0x619   :  { %v686_v6 = vpop.f32.mrb[10].mxu0 }
 0x61a   :  { %v692_v7 = vadd.f32 %v690_v4, %v505_v48  ;;  %v2163_v9 = vpop.f32.mrb[11].mxu0 }
 0x61c   :  { %v693_v10 = vmax.f32 %v692_v7, 0.0 }
 0x61e   :  { %v3320_v11 = vpack.c.bf16 %v693_v10, %v693_v10 }
 0x620   :  { %v696_v12 = vrot.slane %v3320_v11, 2 }
 0x622   :  { %2181 = vmatmul.mubr.bf16.vlgmr.msra.gmra.mrb[8].mxu1 %v696_v12 }
 0x623   :  { %2205 = vmatpush3.bf16.msra.mxu1 %v3157_v25  ;;  %2220 = vmatprep.mubr.msk.bf16.mxu1 %vm2851_vm0, %v2850_v0 }
 0x624   :  { %2206 = vmatprep.subr.bf16.mxu1 %v2850_v0 }
 0x627   :  { %2207 = vmatpush3.bf16.msra.mxu1 %v3163_v26 }
 0x628   :  { %2208 = vmatprep.subr.bf16.mxu1 %v2850_v0 }
 0x62b   :  { %2209 = vmatpush3.bf16.msra.mxu1 %v3170_v27 }
 0x62c   :  { %2210 = vmatprep.subr.bf16.mxu1 %v2850_v0 }
 0x62f   :  { %2211 = vmatpush3.bf16.msra.mxu1 %v3177_v28 }
 0x630   :  { %2212 = vmatprep.subr.bf16.mxu1 %v2850_v0 }
 0x633   :  { %2213 = vmatpush3.bf16.msra.mxu1 %v3184_v29 }
 0x634   :  { %2214 = vmatprep.subr.bf16.mxu1 %v2850_v0 }
 0x637   :  { %2215 = vmatpush3.bf16.msra.mxu1 %v3191_v30 }
 0x638   :  { %2216 = vmatprep.subr.bf16.mxu1 %v2850_v0 }
 0x63b   :  { %2217 = vmatpush3.bf16.msra.mxu1 %v3198_v31 }
 0x63c   :  { %2218 = vmatprep.subr.bf16.mxu1 %v2850_v0 }
 0x63f   :  { %2219 = vmatpush3.bf16.msra.mxu1 %v3205_v32 }
 0x640   :  { %2244 = vmatprep.subr.bf16.mxu1 %v2850_v0 }
 0x6f5   :  { %v732_v13 = vpop.f32.mrb[8].mxu1 }
 0x6f6   :  { %v739_v14 = vrot.slane %v732_v13, 2  ;;  %v2182_v15 = vpop.f32.mrb[9].mxu1 }
 0x6f7   :  { %v735_v16 = vpop.f32.mrb[10].mxu1  ;;  %v962_v15 = vrot.slane %v3320_v11, 1 }
 0x6f8   :  { %v741_v17 = vadd.f32 %v739_v14, %v3275_v49  ;;  %v2183_v18 = vpop.f32.mrb[11].mxu1 }
 0x6f9   :  { %v966_v18 = vrot.slane %v3299_v1, 7 }
 0x6fa   :  { %v742_v19 = vmax.f32 %v741_v17, 0.0 }
 0x6fc   :  { %v3342_v20 = vpack.c.bf16 %v742_v19, %v742_v19 }
 0x6fe   :  { %v749_v21 = vrot.slane %v3342_v20, 3 }
 0x700   :  { %2201 = vmatmul.mubr.bf16.vlgmr.msra.gmra.mrb[12].mxu0 %v749_v21 }
 0x701   :  { %2225 = vmatpush3.bf16.msra.mxu0 %v3157_v25  ;;  %2240 = vmatprep.mubr.msk.bf16.mxu0 %vm2851_vm0, %v2850_v0 }
 0x702   :  { %2226 = vmatprep.subr.bf16.mxu0 %v2850_v0 }
 0x705   :  { %2227 = vmatpush3.bf16.msra.mxu0 %v3163_v26 }
 0x706   :  { %2228 = vmatprep.subr.bf16.mxu0 %v2850_v0 }
 0x709   :  { %2229 = vmatpush3.bf16.msra.mxu0 %v3170_v27 }
 0x70a   :  { %2230 = vmatprep.subr.bf16.mxu0 %v2850_v0 }
 0x70d   :  { %2231 = vmatpush3.bf16.msra.mxu0 %v3177_v28 }
 0x70e   :  { %2232 = vmatprep.subr.bf16.mxu0 %v2850_v0 }
 0x711   :  { %2233 = vmatpush3.bf16.msra.mxu0 %v3184_v29 }
 0x712   :  { %2234 = vmatprep.subr.bf16.mxu0 %v2850_v0 }
 0x715   :  { %2235 = vmatpush3.bf16.msra.mxu0 %v3191_v30 }
 0x716   :  { %2236 = vmatprep.subr.bf16.mxu0 %v2850_v0 }
 0x719   :  { %2237 = vmatpush3.bf16.msra.mxu0 %v3198_v31 }
 0x71a   :  { %2238 = vmatprep.subr.bf16.mxu0 %v2850_v0 }
 0x71d   :  { %2239 = vmatpush3.bf16.msra.mxu0 %v3205_v32 }
 0x71e   :  { %2264 = vmatprep.subr.bf16.mxu0 %v2850_v0 }
 0x7d3   :  { %v785_v22 = vpop.f32.mrb[12].mxu0 }
 0x7d4   :  { %v791_v23 = vadd.f32 %v785_v22, %v3268_v46  ;;  %v2202_v33 = vpop.f32.mrb[13].mxu0 }
 0x7d5   :  { %v788_v34 = vpop.f32.mrb[14].mxu0 }
 0x7d6   :  { %v792_v35 = vmax.f32 %v791_v23, 0.0  ;;  %v2203_v36 = vpop.f32.mrb[15].mxu0 }
 0x7d8   :  { %v3366_v37 = vpack.c.bf16 %v792_v35, %v792_v35 }
 0x7da   :  { %2221 = vmatmul.mubr.bf16.vlgmr.msra.gmra.mrb[12].mxu1 %v3366_v37  ;;  %v955_v16 = vrot.slane %v3366_v37, 5  ;;  %v961_v19 = vsel %vm400_vm10, %v3366_v37, %v749_v21 }
 0x7db   :  { %2245 = vmatpush3.bf16.msra.mxu1 %v3157_v25  ;;  %2260 = vmatprep.mubr.msk.bf16.mxu1 %vm2851_vm0, %v2850_v0  ;;  %v976_v37 = vrot.slane %v961_v19, 4 }
 0x7dc   :  { %2246 = vmatprep.subr.bf16.mxu1 %v2850_v0  ;;  %v958_v21 = vsel %vm400_vm10, %v3342_v20, %v955_v16 }
 0x7df   :  { %2247 = vmatpush3.bf16.msra.mxu1 %v3163_v26 }
 0x7e0   :  { %2248 = vmatprep.subr.bf16.mxu1 %v2850_v0 }
 0x7e3   :  { %2249 = vmatpush3.bf16.msra.mxu1 %v3170_v27 }
 0x7e4   :  { %2250 = vmatprep.subr.bf16.mxu1 %v2850_v0 }
 0x7e7   :  { %2251 = vmatpush3.bf16.msra.mxu1 %v3177_v28 }
 0x7e8   :  { %2252 = vmatprep.subr.bf16.mxu1 %v2850_v0 }
 0x7eb   :  { %2253 = vmatpush3.bf16.msra.mxu1 %v3184_v29 }
 0x7ec   :  { %2254 = vmatprep.subr.bf16.mxu1 %v2850_v0 }
 0x7ef   :  { %2255 = vmatpush3.bf16.msra.mxu1 %v3191_v30 }
 0x7f0   :  { %2256 = vmatprep.subr.bf16.mxu1 %v2850_v0 }
 0x7f3   :  { %2257 = vmatpush3.bf16.msra.mxu1 %v3198_v31  ;;  %v2511_v31 = vld [vmem:[#allocation10] sm:$0xff]  }
 0x7f4   :  { %2258 = vmatprep.subr.bf16.mxu1 %v2850_v0 }
 0x7f7   :  { %2259 = vmatpush3.bf16.msra.mxu1 %v3205_v32  ;;  %v2512_v32 = vld [vmem:[#allocation10 + $0x8] sm:$0xff]  }
 0x7f8   :  { %2284 = vmatprep.subr.bf16.mxu1 %v2850_v0 }
 0x8ad   :  { %v831_v25 = vpop.f32.mrb[12].mxu1 }
 0x8ae   :  { %v838_v26 = vrot.slane %v831_v25, 6  ;;  %v2222_v27 = vpop.f32.mrb[13].mxu1 }
 0x8af   :  { %v834_v28 = vpop.f32.mrb[14].mxu1 }
 0x8b0   :  { %v840_v29 = vadd.f32 %v838_v26, %v3271_v47  ;;  %v2223_v38 = vpop.f32.mrb[15].mxu1 }
 0x8b2   :  { %v841_v39 = vmax.f32 %v840_v29, 0.0 }
 0x8b4   :  { %v3388_v40 = vpack.c.bf16 %v841_v39, %v841_v39 }
 0x8b6   :  { %v844_v30 = vrot.slane %v3388_v40, 1  ;;  %v950_v14 = vrot.slane %v3388_v40, 7  ;;  %v965_v22 = vsel %vm400_vm10, %v3388_v40, %v962_v15 }
 0x8b8   :  { %2241 = vmatmul.mubr.bf16.vlgmr.msra.gmra.mrb[16].mxu0 %v844_v30  ;;  %v953_v34 = vsel %vm400_vm10, %v3320_v11, %v950_v14 }
 0x8b9   :  { %2280 = vmatprep.mubr.msk.bf16.mxu0 %vm2851_vm0, %v2850_v0  ;;  %2265 = vmatpush3.bf16.msra.mxu0 %v2511_v31 }
 0x8ba   :  { %2266 = vmatprep.subr.bf16.mxu0 %v2850_v0 }
 0x8bd   :  { %2267 = vmatpush3.bf16.msra.mxu0 %v2512_v32  ;;  %v1027_v32 = vld [vmem:[#allocation13] sm:$0x1] }
 0x8be   :  { %2268 = vmatprep.subr.bf16.mxu0 %v2850_v0 }
 0x8c1   :  { %2269 = vmatpush3.bf16.msra.mxu0 %v2513_v41  ;;  %v1028_v41 = vunpack.c.l.bf16 %v1027_v32 }
 0x8c2   :  { %2270 = vmatprep.subr.bf16.mxu0 %v2850_v0 }
 0x98b   :  { %v880_v42 = vpop.f32.mrb[16].mxu0 }
 0x98c   :  { %v887_v43 = vrot.slane %v880_v42, 4  ;;  %v2242_v44 = vpop.f32.mrb[17].mxu0  ;;  %v1032_v42 = vrot.slane %v1028_v41, %v3135_v8 }
 0x98d   :  { %v883_v45 = vpop.f32.mrb[18].mxu0 }
 0x98e   :  { %v889_v48 = vadd.f32 %v887_v43, %v3268_v46  ;;  %v2243_v49 = vpop.f32.mrb[19].mxu0  ;;  %v3409_v46 = vld [vmem:[#allocation12 + $0x10] sm:$0xff]  }
 0x990   :  { %v890_v50 = vmax.f32 %v889_v48, 0.0 }
 0x992   :  { %v3397_v51 = vpack.c.bf16 %v890_v50, %v890_v50 }
 0x994   :  { %v893_v53 = vrot.slane %v3397_v51, 2  ;;  %v946_v12 = vrot.slane %v3397_v51, 1  ;;  %v969_v35 = vsel %vm400_vm10, %v3397_v51, %v966_v18 }
 0x996   :  { %2261 = vmatmul.mubr.bf16.vlgmr.msra.gmra.mrb[16].mxu1 %v893_v53  ;;  %v949_v23 = vsel %vm400_vm10, %v3299_v1, %v946_v12  ;;  %v978_v1 = vrot.slane %v965_v22, 4 }
 0x997   :  { %2285 = vmatpush3.bf16.msra.mxu1 %v3399_v52  ;;  %2300 = vmatprep.mubr.msk.bf16.mxu1 %vm2851_vm0, %v2850_v0 }
 0x998   :  { %2286 = vmatprep.subr.bf16.mxu1 %v2850_v0 }
 0x99b   :  { %2287 = vmatpush3.bf16.msra.mxu1 %v3403_v54 }
 0x99c   :  { %2288 = vmatprep.subr.bf16.mxu1 %v2850_v0 }
 0x99f   :  { %2289 = vmatpush3.bf16.msra.mxu1 %v3409_v46 }
 0x9a0   :  { %2290 = vmatprep.subr.bf16.mxu1 %v2850_v0 }
 0x9a3   :  { %2291 = vmatpush3.bf16.msra.mxu1 %v3413_v55 }
 0x9a4   :  { %2292 = vmatprep.subr.bf16.mxu1 %v2850_v0 }
 0x9a7   :  { %2293 = vmatpush3.bf16.msra.mxu1 %v3417_v57 }
 0x9a8   :  { %2294 = vmatprep.subr.bf16.mxu1 %v2850_v0 }
 0x9ab   :  { %2295 = vmatpush3.bf16.msra.mxu1 %v3421_v58 }
 0x9ac   :  { %2296 = vmatprep.subr.bf16.mxu1 %v2850_v0 }
 0x9af   :  { %2297 = vmatpush3.bf16.msra.mxu1 %v3425_v59 }
 0x9b0   :  { %2298 = vmatprep.subr.bf16.mxu1 %v2850_v0 }
 0x9b3   :  { %2299 = vmatpush3.bf16.msra.mxu1 %v3429_v60 }
 0x9b4   :  { %2324 = vmatprep.subr.bf16.mxu1 %v2850_v0 }
 0x9b6   :  { %2301 = vmatmul.mubr.bf16.vlgmr.msra.gmra.mrb[20].mxu1 %v3245_v24  ;;  %v2514_v24 = vld [vmem:[#allocation10 + $0x18] sm:$0xff]  }
 0x9b7   :  { %2325 = vmatpush3.bf16.msra.mxu1 %v3399_v52  ;;  %2340 = vmatprep.mubr.msk.bf16.mxu1 %vm2851_vm0, %v2850_v0 }
 0x9b8   :  { %2326 = vmatprep.subr.bf16.mxu1 %v2850_v0  ;;  %2271 = vmatpush3.bf16.msra.mxu0 %v2514_v24 }
 0x9b9   :  { %2272 = vmatprep.subr.bf16.mxu0 %v2850_v0 }
 0x9bb   :  { %2327 = vmatpush3.bf16.msra.mxu1 %v3403_v54 }
 0x9bc   :  { %2328 = vmatprep.subr.bf16.mxu1 %v2850_v0  ;;  %2273 = vmatpush3.bf16.msra.mxu0 %v2515_v61 }
 0x9bd   :  { %2274 = vmatprep.subr.bf16.mxu0 %v2850_v0 }
 0x9bf   :  { %2329 = vmatpush3.bf16.msra.mxu1 %v3409_v46 }
 0x9c0   :  { %2330 = vmatprep.subr.bf16.mxu1 %v2850_v0  ;;  %2275 = vmatpush3.bf16.msra.mxu0 %v2516_v62 }
 0x9c1   :  { %2276 = vmatprep.subr.bf16.mxu0 %v2850_v0 }
 0x9c3   :  { %2331 = vmatpush3.bf16.msra.mxu1 %v3413_v55 }
 0x9c4   :  { %2332 = vmatprep.subr.bf16.mxu1 %v2850_v0  ;;  %2277 = vmatpush3.bf16.msra.mxu0 %v2517_v63 }
 0x9c5   :  { %2278 = vmatprep.subr.bf16.mxu0 %v2850_v0 }
 0x9c7   :  { %2333 = vmatpush3.bf16.msra.mxu1 %v3417_v57 }
 0x9c8   :  { %2334 = vmatprep.subr.bf16.mxu1 %v2850_v0  ;;  %2279 = vmatpush3.bf16.msra.mxu0 %v2518_v2 }
 0x9c9   :  { %2304 = vmatprep.subr.bf16.mxu0 %v2850_v0 }
 0x9cb   :  { %2335 = vmatpush3.bf16.msra.mxu1 %v3421_v58 }
 0x9cc   :  { %2336 = vmatprep.subr.bf16.mxu1 %v2850_v0 }
 0x9cf   :  { %2337 = vmatpush3.bf16.msra.mxu1 %v3425_v59 }
 0x9d0   :  { %2338 = vmatprep.subr.bf16.mxu1 %v2850_v0 }
 0x9d3   :  { %2339 = vmatpush3.bf16.msra.mxu1 %v3429_v60 }
 0x9d4   :  { %2364 = vmatprep.subr.bf16.mxu1 %v2850_v0 }
 0xa69   :  { %v929_v3 = vpop.f32.mrb[16].mxu1 }
 0xa6a   :  { %v936_v4 = vrot.slane %v929_v3, 2  ;;  %v2262_v5 = vpop.f32.mrb[17].mxu1 }
 0xa6b   :  { %v932_v6 = vpop.f32.mrb[18].mxu1 }
 0xa6c   :  { %v938_v7 = vadd.f32 %v936_v4, %v3271_v47  ;;  %v2263_v9 = vpop.f32.mrb[19].mxu1  ;;  %v971_v47 = vrot.slane %v3277_v56, 5 }
 0xa6e   :  { %v939_v10 = vmax.f32 %v938_v7, 0.0 }
 0xa70   :  { %v940_v13 = vpack.c.bf16 %v939_v10, %v939_v10 }
 0xa72   :  { %v942_v17 = vrot.slane %v940_v13, 3  ;;  %v974_v25 = vsel %vm400_vm10, %v940_v13, %v971_v47 }
 0xa73   :  { %v982_v11 = vrot.slane %v974_v25, 4 }
 0xa74   :  { %v945_v33 = vsel %vm400_vm10, %v3277_v56, %v942_v17  ;;  %v980_v56 = vrot.slane %v969_v35, 4 }
 0xa75   :  { %v983_v36 = vsel %vm375_vm3, %v945_v33, %v949_v23 }
 0xa76   :  { %v984_v26 = vsel %vm379_vm4, %v983_v36, %v953_v34 }
 0xa77   :  { %v985_v27 = vsel %vm382_vm5, %v984_v26, %v958_v21 }
 0xa78   :  { %v987_v28 = vsel %vm385_vm6, %v985_v27, %v976_v37 }
 0xa79   :  { %v989_v29 = vsel %vm388_vm7, %v987_v28, %v978_v1 }
 0xa7a   :  { %v991_v38 = vsel %vm391_vm8, %v989_v29, %v980_v56 }
 0xa7b   :  { %v993_v39 = vsel %vm394_vm9, %v991_v38, %v982_v11 }
 0xa7c   :  { %2281 = vmatmul.mubr.bf16.vlgmr.msra.gmra.mrb[20].mxu0 %v993_v39 }
 0xa7d   :  { %2305 = vmatpush3.bf16.msra.mxu0 %v3399_v52  ;;  %2320 = vmatprep.mubr.msk.bf16.mxu0 %vm2851_vm0, %v2850_v0 }
 0xa7e   :  { %2306 = vmatprep.subr.bf16.mxu0 %v2850_v0 }
 0xa81   :  { %2307 = vmatpush3.bf16.msra.mxu0 %v3403_v54 }
 0xa82   :  { %2308 = vmatprep.subr.bf16.mxu0 %v2850_v0 }
 0xa85   :  { %2309 = vmatpush3.bf16.msra.mxu0 %v3409_v46 }
 0xa86   :  { %2310 = vmatprep.subr.bf16.mxu0 %v2850_v0 }
 0xa89   :  { %v1208_v20 = vpop.f32.mrb[20].mxu1  ;;  %2311 = vmatpush3.bf16.msra.mxu0 %v3413_v55 }
 0xa8a   :  { %v2302_v40 = vpop.f32.mrb[21].mxu1  ;;  %2312 = vmatprep.subr.bf16.mxu0 %v2850_v0 }
 0xa8b   :  { %v1211_v30 = vpop.f32.mrb[22].mxu1 }
 0xa8c   :  { %v2303_v31 = vpop.f32.mrb[23].mxu1 }
 0xa8d   :  { %2313 = vmatpush3.bf16.msra.mxu0 %v3417_v57 }
 0xa8e   :  { %2314 = vmatprep.subr.bf16.mxu0 %v2850_v0 }
 0xa91   :  { %2315 = vmatpush3.bf16.msra.mxu0 %v3421_v58 }
 0xa92   :  { %2316 = vmatprep.subr.bf16.mxu0 %v2850_v0 }
 0xa95   :  { %2317 = vmatpush3.bf16.msra.mxu0 %v3425_v59 }
 0xa96   :  { %2318 = vmatprep.subr.bf16.mxu0 %v2850_v0 }
 0xa99   :  { %2319 = vmatpush3.bf16.msra.mxu0 %v3429_v60 }
 0xa9a   :  { %2344 = vmatprep.subr.bf16.mxu0 %v2850_v0 }
 0xb4f   :  { %v1115_v43 = vpop.f32.mrb[20].mxu0 }
 0xb50   :  { %v1116_v44 = vadd.f32 %v1115_v43, %v1032_v42  ;;  %v2282_v45 = vpop.f32.mrb[21].mxu0  ;;  %v2521_v43 = vld [vmem:[%s3717_s12 + $0x10] sm:$0xff]  }
 0xb51   :  { %v1118_v48 = vpop.f32.mrb[22].mxu0 }
 0xb52   :  { %v1119_v49 = vadd.f32 %v1118_v48, %v1032_v42  ;;  %v2283_v50 = vpop.f32.mrb[23].mxu0  ;;  %v1365_v51 = vrot.slane %v1116_v44, 6  ;;  %v1414_v53 = vrot.slane %v1116_v44, 2 }
 0xb54   :  { %v1123_v24 = vrot.slane %v1119_v49, 6  ;;  %v1217_v61 = vrot.slane %v1119_v49, 2  ;;  %v3509_v62 = vsel %vm400_vm10, %v1119_v49, %v1365_v51  ;;  %v3512_v63 = vsel %vm400_vm10, %v1119_v49, %v1414_v53 }
 0xb56   :  { %v1125_v2 = vsel %vm400_vm10, %v1116_v44, %v1123_v24  ;;  %v3516_v3 = vsel %vm400_vm10, %v1116_v44, %v1217_v61 }
 0xb57   :  { %v1214_v4 = vadd.f32 %v1208_v20, %v1125_v2 }
 0xb59   :  { %v1215_v5 = vmax.f32 %v1214_v4, 0.0  ;;  %v2525_v4 = vld [vmem:[%s3717_s12 + $0x30] sm:$0xff]  }
 0xb5b   :  { %v3518_v6 = vpack.c.bf16 %v1215_v5, %v1215_v5  ;;  %v2526_v5 = vld [vmem:[%s3717_s12 + $0x38] sm:$0xff]  }
 0xb5d   :  { %2321 = vmatmul.mubr.bf16.vlgmr.msra.gmra.mrb[24].mxu0 %v3518_v6 }
 0xb5e   :  { %2345 = vmatpush3.bf16.msra.mxu0 %v3399_v52  ;;  %2360 = vmatprep.mubr.msk.bf16.mxu0 %vm2851_vm0, %v2850_v0 }
 0xb5f   :  { %2346 = vmatprep.subr.bf16.mxu0 %v2850_v0 }
 0xb62   :  { %2347 = vmatpush3.bf16.msra.mxu0 %v3403_v54 }
 0xb63   :  { %2348 = vmatprep.subr.bf16.mxu0 %v2850_v0 }
 0xb66   :  { %2349 = vmatpush3.bf16.msra.mxu0 %v3409_v46 }
 0xb67   :  { %2350 = vmatprep.subr.bf16.mxu0 %v2850_v0 }
 0xb6a   :  { %2351 = vmatpush3.bf16.msra.mxu0 %v3413_v55 }
 0xb6b   :  { %2352 = vmatprep.subr.bf16.mxu0 %v2850_v0 }
 0xb6e   :  { %2353 = vmatpush3.bf16.msra.mxu0 %v3417_v57 }
 0xb6f   :  { %2354 = vmatprep.subr.bf16.mxu0 %v2850_v0 }
 0xb72   :  { %2355 = vmatpush3.bf16.msra.mxu0 %v3421_v58 }
 0xb73   :  { %2356 = vmatprep.subr.bf16.mxu0 %v2850_v0 }
 0xb76   :  { %2357 = vmatpush3.bf16.msra.mxu0 %v3425_v59 }
 0xb77   :  { %2358 = vmatprep.subr.bf16.mxu0 %v2850_v0 }
 0xb7a   :  { %2359 = vmatpush3.bf16.msra.mxu0 %v3429_v60 }
 0xb7b   :  { %2384 = vmatprep.subr.bf16.mxu0 %v2850_v0 }
 0xc30   :  { %v1254_v7 = vpop.f32.mrb[24].mxu0 }
 0xc31   :  { %v1261_v9 = vrot.slane %v1254_v7, 6  ;;  %v2322_v10 = vpop.f32.mrb[25].mxu0 }
 0xc32   :  { %v1257_v12 = vpop.f32.mrb[26].mxu0 }
 0xc33   :  { %v1263_v13 = vadd.f32 %v1261_v9, %v3516_v3  ;;  %v2323_v14 = vpop.f32.mrb[27].mxu0 }
 0xc35   :  { %v1264_v15 = vmax.f32 %v1263_v13, 0.0 }
 0xc37   :  { %v3540_v16 = vpack.c.bf16 %v1264_v15, %v1264_v15 }
 0xc39   :  { %v1267_v17 = vrot.slane %v3540_v16, 1 }
 0xc3b   :  { %2341 = vmatmul.mubr.bf16.vlgmr.msra.gmra.mrb[24].mxu1 %v1267_v17 }
 0xc3c   :  { %2365 = vmatpush3.bf16.msra.mxu1 %v3399_v52  ;;  %2380 = vmatprep.mubr.msk.bf16.mxu1 %vm2851_vm0, %v2850_v0 }
 0xc3d   :  { %2366 = vmatprep.subr.bf16.mxu1 %v2850_v0 }
 0xc40   :  { %2367 = vmatpush3.bf16.msra.mxu1 %v3403_v54 }
 0xc41   :  { %2368 = vmatprep.subr.bf16.mxu1 %v2850_v0 }
 0xc44   :  { %2369 = vmatpush3.bf16.msra.mxu1 %v3409_v46 }
 0xc45   :  { %2370 = vmatprep.subr.bf16.mxu1 %v2850_v0 }
 0xc48   :  { %2371 = vmatpush3.bf16.msra.mxu1 %v3413_v55 }
 0xc49   :  { %2372 = vmatprep.subr.bf16.mxu1 %v2850_v0 }
 0xc4c   :  { %2373 = vmatpush3.bf16.msra.mxu1 %v3417_v57 }
 0xc4d   :  { %2374 = vmatprep.subr.bf16.mxu1 %v2850_v0 }
 0xc50   :  { %2375 = vmatpush3.bf16.msra.mxu1 %v3421_v58 }
 0xc51   :  { %2376 = vmatprep.subr.bf16.mxu1 %v2850_v0 }
 0xc54   :  { %2377 = vmatpush3.bf16.msra.mxu1 %v3425_v59 }
 0xc55   :  { %2378 = vmatprep.subr.bf16.mxu1 %v2850_v0 }
 0xc58   :  { %2379 = vmatpush3.bf16.msra.mxu1 %v3429_v60 }
 0xc59   :  { %2404 = vmatprep.subr.bf16.mxu1 %v2850_v0 }
 0xd0e   :  { %v1303_v18 = vpop.f32.mrb[24].mxu1 }
 0xd0f   :  { %v1310_v19 = vrot.slane %v1303_v18, 4  ;;  %v2342_v47 = vpop.f32.mrb[25].mxu1 }
 0xd10   :  { %v1306_v22 = vpop.f32.mrb[26].mxu1 }
 0xd11   :  { %v1312_v23 = vadd.f32 %v1310_v19, %v1125_v2  ;;  %v2343_v33 = vpop.f32.mrb[27].mxu1  ;;  %v2522_v2 = vld [vmem:[%s3717_s12 + $0x18] sm:$0xff]  }
 0xd12   :  { %v1586_v33 = vrot.slane %v3540_v16, 7 }
 0xd13   :  { %v1313_v34 = vmax.f32 %v1312_v23, 0.0 }
 0xd15   :  { %v3561_v35 = vpack.c.bf16 %v1313_v34, %v1313_v34 }
 0xd17   :  { %v1316_v36 = vrot.slane %v3561_v35, 2  ;;  %v1582_v47 = vrot.slane %v3561_v35, 1 }
 0xd19   :  { %2361 = vmatmul.mubr.bf16.vlgmr.msra.gmra.mrb[28].mxu0 %v1316_v36  ;;  %v1591_v36 = vrot.slane %v3518_v6, 5 }
 0xd1a   :  { %2385 = vmatpush3.bf16.msra.mxu0 %v3399_v52  ;;  %2400 = vmatprep.mubr.msk.bf16.mxu0 %vm2851_vm0, %v2850_v0 }
 0xd1b   :  { %2386 = vmatprep.subr.bf16.mxu0 %v2850_v0 }
 0xd1e   :  { %2387 = vmatpush3.bf16.msra.mxu0 %v3403_v54 }
 0xd1f   :  { %2388 = vmatprep.subr.bf16.mxu0 %v2850_v0 }
 0xd22   :  { %2389 = vmatpush3.bf16.msra.mxu0 %v3409_v46 }
 0xd23   :  { %2390 = vmatprep.subr.bf16.mxu0 %v2850_v0 }
 0xd26   :  { %2391 = vmatpush3.bf16.msra.mxu0 %v3413_v55 }
 0xd27   :  { %2392 = vmatprep.subr.bf16.mxu0 %v2850_v0 }
 0xd2a   :  { %2393 = vmatpush3.bf16.msra.mxu0 %v3417_v57 }
 0xd2b   :  { %2394 = vmatprep.subr.bf16.mxu0 %v2850_v0 }
 0xd2e   :  { %2395 = vmatpush3.bf16.msra.mxu0 %v3421_v58 }
 0xd2f   :  { %2396 = vmatprep.subr.bf16.mxu0 %v2850_v0 }
 0xd32   :  { %2397 = vmatpush3.bf16.msra.mxu0 %v3425_v59 }
 0xd33   :  { %2398 = vmatprep.subr.bf16.mxu0 %v2850_v0 }
 0xd36   :  { %2399 = vmatpush3.bf16.msra.mxu0 %v3429_v60 }
 0xd37   :  { %2424 = vmatprep.subr.bf16.mxu0 %v2850_v0 }
 0xdec   :  { %v1352_v21 = vpop.f32.mrb[28].mxu0 }
 0xded   :  { %v1359_v37 = vrot.slane %v1352_v21, 2  ;;  %v2362_v25 = vpop.f32.mrb[29].mxu0 }
 0xdee   :  { %v1355_v26 = vpop.f32.mrb[30].mxu0 }
 0xdef   :  { %v1361_v1 = vadd.f32 %v1359_v37, %v3516_v3  ;;  %v2363_v27 = vpop.f32.mrb[31].mxu0  ;;  %v2523_v3 = vld [vmem:[%s3717_s12 + $0x20] sm:$0xff]  }
 0xdf1   :  { %v1362_v56 = vmax.f32 %v1361_v1, 0.0 }
 0xdf3   :  { %v3583_v28 = vpack.c.bf16 %v1362_v56, %v1362_v56 }
 0xdf5   :  { %v1369_v11 = vrot.slane %v3583_v28, 3 }
 0xdf7   :  { %2381 = vmatmul.mubr.bf16.vlgmr.msra.gmra.mrb[28].mxu1 %v1369_v11 }
 0xdf8   :  { %2405 = vmatpush3.bf16.msra.mxu1 %v3399_v52  ;;  %2420 = vmatprep.mubr.msk.bf16.mxu1 %vm2851_vm0, %v2850_v0 }
 0xdf9   :  { %2406 = vmatprep.subr.bf16.mxu1 %v2850_v0 }
 0xdfc   :  { %2407 = vmatpush3.bf16.msra.mxu1 %v3403_v54 }
 0xdfd   :  { %2408 = vmatprep.subr.bf16.mxu1 %v2850_v0 }
 0xe00   :  { %2409 = vmatpush3.bf16.msra.mxu1 %v3409_v46 }
 0xe01   :  { %2410 = vmatprep.subr.bf16.mxu1 %v2850_v0 }
 0xe04   :  { %2411 = vmatpush3.bf16.msra.mxu1 %v3413_v55 }
 0xe05   :  { %2412 = vmatprep.subr.bf16.mxu1 %v2850_v0 }
 0xe08   :  { %2413 = vmatpush3.bf16.msra.mxu1 %v3417_v57 }
 0xe09   :  { %2414 = vmatprep.subr.bf16.mxu1 %v2850_v0 }
 0xe0c   :  { %2415 = vmatpush3.bf16.msra.mxu1 %v3421_v58 }
 0xe0d   :  { %2416 = vmatprep.subr.bf16.mxu1 %v2850_v0 }
 0xe10   :  { %2417 = vmatpush3.bf16.msra.mxu1 %v3425_v59 }
 0xe11   :  { %2418 = vmatprep.subr.bf16.mxu1 %v2850_v0 }
 0xe14   :  { %2419 = vmatpush3.bf16.msra.mxu1 %v3429_v60 }
 0xe15   :  { %2444 = vmatprep.subr.bf16.mxu1 %v2850_v0 }
 0xeca   :  { %v1405_v29 = vpop.f32.mrb[28].mxu1 }
 0xecb   :  { %v1411_v38 = vadd.f32 %v1405_v29, %v3509_v62  ;;  %v2382_v39 = vpop.f32.mrb[29].mxu1 }
 0xecc   :  { %v1408_v20 = vpop.f32.mrb[30].mxu1 }
 0xecd   :  { %v1412_v40 = vmax.f32 %v1411_v38, 0.0  ;;  %v2383_v30 = vpop.f32.mrb[31].mxu1 }
 0xecf   :  { %v3607_v31 = vpack.c.bf16 %v1412_v40, %v1412_v40 }
 0xed1   :  { %2401 = vmatmul.mubr.bf16.vlgmr.msra.gmra.mrb[32].mxu0 %v3607_v31  ;;  %v1575_v22 = vrot.slane %v3607_v31, 5  ;;  %v1581_v34 = vsel %vm400_vm10, %v3607_v31, %v1369_v11 }
 0xed2   :  { %2425 = vmatpush3.bf16.msra.mxu0 %v3399_v52  ;;  %2440 = vmatprep.mubr.msk.bf16.mxu0 %vm2851_vm0, %v2850_v0  ;;  %v1596_v56 = vrot.slane %v1581_v34, 4 }
 0xed3   :  { %2426 = vmatprep.subr.bf16.mxu0 %v2850_v0  ;;  %v1578_v27 = vsel %vm400_vm10, %v3583_v28, %v1575_v22  ;;  %v1631_v28 = vld [vmem:[#allocation15] sm:$0x1] }
 0xed4   :  { %v1632_v31 = vunpack.c.l.bf16 %v1631_v28 }
 0xed6   :  { %2427 = vmatpush3.bf16.msra.mxu0 %v3403_v54 }
 0xed7   :  { %2428 = vmatprep.subr.bf16.mxu0 %v2850_v0 }
 0xeda   :  { %2429 = vmatpush3.bf16.msra.mxu0 %v3409_v46 }
 0xedb   :  { %2430 = vmatprep.subr.bf16.mxu0 %v2850_v0 }
 0xede   :  { %2431 = vmatpush3.bf16.msra.mxu0 %v3413_v55 }
 0xedf   :  { %2432 = vmatprep.subr.bf16.mxu0 %v2850_v0 }
 0xee2   :  { %2433 = vmatpush3.bf16.msra.mxu0 %v3417_v57 }
 0xee3   :  { %2434 = vmatprep.subr.bf16.mxu0 %v2850_v0 }
 0xee6   :  { %2435 = vmatpush3.bf16.msra.mxu0 %v3421_v58 }
 0xee7   :  { %2436 = vmatprep.subr.bf16.mxu0 %v2850_v0 }
 0xeea   :  { %2437 = vmatpush3.bf16.msra.mxu0 %v3425_v59  ;;  %v2519_v59 = vld [vmem:[%s3717_s12] sm:$0xff]  }
 0xeeb   :  { %2438 = vmatprep.subr.bf16.mxu0 %v2850_v0 }
 0xeee   :  { %2439 = vmatpush3.bf16.msra.mxu0 %v3429_v60  ;;  %v2520_v60 = vld [vmem:[%s3717_s12 + $0x8] sm:$0xff]  }
 0xeef   :  { %2464 = vmatprep.subr.bf16.mxu0 %v2850_v0 }
 0xfa4   :  { %v1451_v52 = vpop.f32.mrb[32].mxu0 }
 0xfa5   :  { %v1458_v54 = vrot.slane %v1451_v52, 6  ;;  %v2402_v46 = vpop.f32.mrb[33].mxu0  ;;  %v1636_v52 = vrot.slane %v1632_v31, %v3135_v8 }
 0xfa6   :  { %v1454_v55 = vpop.f32.mrb[34].mxu0 }
 0xfa7   :  { %v1460_v57 = vadd.f32 %v1458_v54, %v3512_v63  ;;  %v2403_v32 = vpop.f32.mrb[35].mxu0 }
 0xfa9   :  { %v1461_v41 = vmax.f32 %v1460_v57, 0.0 }
 0xfab   :  { %v1462_v42 = vpack.c.bf16 %v1461_v41, %v1461_v41 }
 0xfad   :  { %v1464_v58 = vrot.slane %v1462_v42, 1  ;;  %v1570_v19 = vrot.slane %v1462_v42, 7 }
 0xfaf   :  { %2421 = vmatmul.mubr.bf16.vlgmr.msra.gmra.mrb[32].mxu1 %v1464_v58  ;;  %v1573_v25 = vsel %vm400_vm10, %v3561_v35, %v1570_v19 }
 0xfb0   :  { %2460 = vmatprep.mubr.msk.bf16.mxu1 %vm2851_vm0, %v2850_v0  ;;  %2445 = vmatpush3.bf16.msra.mxu1 %v2519_v59 }
 0xfb1   :  { %2446 = vmatprep.subr.bf16.mxu1 %v2850_v0 }
 0xfb4   :  { %2447 = vmatpush3.bf16.msra.mxu1 %v2520_v60 }
 0xfb5   :  { %2448 = vmatprep.subr.bf16.mxu1 %v2850_v0 }
 0xfb8   :  { %2449 = vmatpush3.bf16.msra.mxu1 %v2521_v43 }
 0xfb9   :  { %2450 = vmatprep.subr.bf16.mxu1 %v2850_v0 }
 0xfbc   :  { %2451 = vmatpush3.bf16.msra.mxu1 %v2522_v2 }
 0xfbd   :  { %2452 = vmatprep.subr.bf16.mxu1 %v2850_v0 }
 0xfc0   :  { %2453 = vmatpush3.bf16.msra.mxu1 %v2523_v3 }
 0xfc1   :  { %2454 = vmatprep.subr.bf16.mxu1 %v2850_v0 }
0x1082   :  { %v1500_v44 = vpop.f32.mrb[32].mxu1 }
0x1083   :  { %v1507_v45 = vrot.slane %v1500_v44, 4  ;;  %v2422_v48 = vpop.f32.mrb[33].mxu1 }
0x1084   :  { %v1503_v49 = vpop.f32.mrb[34].mxu1 }
0x1085   :  { %v1509_v50 = vadd.f32 %v1507_v45, %v3509_v62  ;;  %v2423_v51 = vpop.f32.mrb[35].mxu1  ;;  %v2524_v62 = vld [vmem:[%s3717_s12 + $0x28] sm:$0xff]  }
0x1086   :  { %2455 = vmatpush3.bf16.msra.mxu1 %v2524_v62 }
0x1087   :  { %v1510_v53 = vmax.f32 %v1509_v50, 0.0  ;;  %2456 = vmatprep.subr.bf16.mxu1 %v2850_v0 }
0x1089   :  { %v1511_v24 = vpack.c.bf16 %v1510_v53, %v1510_v53 }
0x108a   :  { %2457 = vmatpush3.bf16.msra.mxu1 %v2525_v4 }
0x108b   :  { %v1513_v61 = vrot.slane %v1511_v24, 2  ;;  %2458 = vmatprep.subr.bf16.mxu1 %v2850_v0  ;;  %v1566_v17 = vrot.slane %v1511_v24, 1  ;;  %v1589_v26 = vsel %vm400_vm10, %v1511_v24, %v1586_v33  ;;  %v2527_v24 = vld [vmem:[#allocation19] sm:$0xff]  }
0x108c   :  { %v1600_v39 = vrot.slane %v1589_v26, 4 }
0x108d   :  { %2441 = vmatmul.mubr.bf16.vlgmr.msra.gmra.mrb[36].mxu0 %v1513_v61  ;;  %v1569_v21 = vsel %vm400_vm10, %v3540_v16, %v1566_v17  ;;  %v2528_v61 = vld [vmem:[#allocation19 + $0x8] sm:$0xff]  }
0x108e   :  { %2468 = vmatprep.mubr.msk.bf16.mxu0 %vm2851_vm0, %v2850_v0  ;;  %2459 = vmatpush3.bf16.msra.mxu1 %v2526_v5 }
0x108f   :  { %2465 = vmatpush3.bf16.msra.mxu0 %v2527_v24 }
0x1090   :  { %2466 = vmatprep.subr.bf16.mxu0 %v2850_v0 }
0x1093   :  { %2467 = vmatpush3.bf16.msra.mxu0 %v2528_v61 }
0x1160   :  { %v1549_v7 = vpop.f32.mrb[36].mxu0 }
0x1161   :  { %v1556_v9 = vrot.slane %v1549_v7, 2  ;;  %v2442_v10 = vpop.f32.mrb[37].mxu0  ;;  %v1726_v7 = vld [vmem:[#allocation16] sm:$0x1] }
0x1162   :  { %v1552_v12 = vpop.f32.mrb[38].mxu0  ;;  %v1727_v10 = vunpack.c.l.bf16 %v1726_v7 }
0x1163   :  { %v1558_v13 = vadd.f32 %v1556_v9, %v3512_v63  ;;  %v2443_v14 = vpop.f32.mrb[39].mxu0  ;;  %v1585_v63 = vsel %vm400_vm10, %v1462_v42, %v1582_v47  ;;  %v1728_v12 = vld [vmem:[#allocation18] sm:$0x1] }
0x1164   :  { %v1598_v38 = vrot.slane %v1585_v63, 4  ;;  %v1729_v14 = vunpack.c.l.bf16 %v1728_v12 }
0x1165   :  { %v1559_v15 = vmax.f32 %v1558_v13, 0.0  ;;  %v1760_v13 = vrot.slane %v1727_v10, %v3135_v8 }
0x1166   :  { %v1766_v0 = vrot.slane %v1729_v14, %v3135_v8 }
0x1167   :  { %v1560_v18 = vpack.c.bf16 %v1559_v15, %v1559_v15 }
0x1169   :  { %v1562_v23 = vrot.slane %v1560_v18, 3  ;;  %v1594_v11 = vsel %vm400_vm10, %v1560_v18, %v1591_v36 }
0x116a   :  { %v1602_v20 = vrot.slane %v1594_v11, 4 }
0x116b   :  { %v1565_v37 = vsel %vm400_vm10, %v3518_v6, %v1562_v23 }
0x116c   :  { %v1603_v1 = vsel %vm375_vm3, %v1565_v37, %v1569_v21  ;;  %v1776_v21 = vld [vmem:[#allocation21] sm:$0x1] }
0x116d   :  { %v1604_v29 = vsel %vm379_vm4, %v1603_v1, %v1573_v25  ;;  %v1777_v37 = vunpack.c.l.bf16 %v1776_v21 }
0x116e   :  { %v1605_v16 = vsel %vm382_vm5, %v1604_v29, %v1578_v27 }
0x116f   :  { %v1607_v6 = vsel %vm385_vm6, %v1605_v16, %v1596_v56  ;;  %v1781_v25 = vrot.slane %v1777_v37, %v3135_v8 }
0x1170   :  { %v1609_v35 = vsel %vm388_vm7, %v1607_v6, %v1598_v38 }
0x1171   :  { %v1611_v40 = vsel %vm391_vm8, %v1609_v35, %v1600_v39 }
0x1172   :  { %v1613_v30 = vsel %vm394_vm9, %v1611_v40, %v1602_v20 }
0x1173   :  { %2461 = vmatmul.mubr.bf16.vlgmr.msra.gmra.mrb[36].mxu1 %v1613_v30 }
0x1246   :  { %v1719_v54 = vpop.f32.mrb[36].mxu1 }
0x1247   :  { %v1720_v46 = vadd.f32 %v1719_v54, %v1636_v52  ;;  %v2462_v55 = vpop.f32.mrb[37].mxu1 }
0x1248   :  { %v1722_v57 = vpop.f32.mrb[38].mxu1 }
0x1249   :  { %v1723_v32 = vadd.f32 %v1722_v57, %v1636_v52  ;;  %v2463_v41 = vpop.f32.mrb[39].mxu1  ;;  %v1730_v42 = vsel %vm239_vm1, %v1720_v46, 0.0 }
0x124a   :  { %1731 = vadd.xlane.f32.xlu1 %v1730_v42 }
0x124b   :  { %v1733_v58 = vsel %vm239_vm1, %v1723_v32, 0.0 }
0x124c   :  { %1734 = vadd.xlane.f32.xlu0 %v1733_v58 }
0x12d7   :  { %v1732_v59 = vpop.xlane.xlu1 %1731 }
0x12d8   :  { %v1737_v60 = vmul.f32 0.03125, %v1732_v59 }
0x12d9   :  { %v1735_v43 = vpop.xlane.xlu0 %1734 }
0x12da   :  { %v1739_v44 = vsub.f32 %v1720_v46, %v1737_v60  ;;  %v1738_v45 = vmul.f32 0.03125, %v1735_v43 }
0x12dc   :  { %v1740_v48 = vsub.f32 %v1723_v32, %v1738_v45  ;;  %v1741_v49 = vmul.f32 %v1739_v44, %v1739_v44 }
0x12de   :  { %v1743_v50 = vsel %vm239_vm1, %v1741_v49, 0.0  ;;  %v1742_v51 = vmul.f32 %v1740_v48, %v1740_v48 }
0x12df   :  { %1744 = vadd.xlane.f32.xlu0 %v1743_v50 }
0x12e0   :  { %v1746_v53 = vsel %vm239_vm1, %v1742_v51, 0.0 }
0x12e3   :  { %1747 = vadd.xlane.f32.xlu0 %v1746_v53 }
0x136c   :  { %v1745_v2 = vpop.xlane.xlu0 %1744 }
0x136d   :  { %v1749_v3 = vmul.f32 0.03125, %v1745_v2 }
0x136f   :  { %v1751_v62 = vadd.f32 1e-05, %v1749_v3 }
0x1370   :  { %v1748_v4 = vpop.xlane.xlu0 %1747 }
0x1371   :  { %2531 = vrsqrt.f32 %v1751_v62  ;;  %v1750_v5 = vmul.f32 0.03125, %v1748_v4 }
0x1373   :  { %v1752_v9 = vadd.f32 1e-05, %v1750_v5 }
0x1375   :  { %2533 = vrsqrt.f32 %v1752_v9 }
0x137b   :  { %v2532_v15 = vpop.eup %2531 }
0x137c   :  { %v1755_v17 = vmul.f32 %v2532_v15, %v1739_v44 }
0x137e   :  { %v1761_v18 = vmul.f32 %v1760_v13, %v1755_v17 }
0x137f   :  { %v2534_v19 = vpop.eup %2533 }
0x1380   :  { %v1756_v47 = vmul.f32 %v2534_v19, %v1740_v48  ;;  %v1767_v23 = vadd.f32 %v1766_v0, %v1761_v18 }
0x1382   :  { %v1762_v22 = vmul.f32 %v1760_v13, %v1756_v47  ;;  %v1769_v34 = vmax.f32 %v1767_v23, 0.0 }
0x1384   :  { %v1768_v33 = vadd.f32 %v1766_v0, %v1762_v22 }
0x1386   :  { %v1770_v36 = vmax.f32 %v1768_v33, 0.0 }
0x1388   :  { %v1771_v63 = vpack.c.bf16 %v1770_v36, %v1769_v34 }
0x138a   :  { %2469 = vmatmul.mubr.msk.bf16.vlgmr.msra.gmra.mrb[40].mxu0 %vm239_vm1, %v1771_v63 }
0x145d   :  { %v1831_v26 = vpop.f32.mrb[40].mxu0 }
0x145e   :  { %v2470_v1 = vpop.f32.mrb[41].mxu0  ;;  %v1832_v56 = vadd.f32 %v1831_v26, %v1781_v25 }
0x145f   :  { %v1834_v27 = vpop.f32.mrb[42].mxu0 }
0x1460   :  { %v1835_v11 = vadd.f32 %v1834_v27, %v1781_v25  ;;  %v2471_v29 = vpop.f32.mrb[43].mxu0 }
0x1462   :  { %v1909_v38 = vpack.c.bf16 %v1835_v11, %v1832_v56 }
0x1464   :  { %1910 = vst [vmem:[%s3723_s18] sm:$0xff] %v1909_v38  }
0x1465   :  { %1852 = vsyncpa [#allocation3], 1 }
0x1466   :  { %1853 = vsyncpa [#allocation5], 1 }
0x1467   :  { %1854 = vsyncpa [#allocation8], 1 }
0x1468   :  { %1855 = vsyncpa [#allocation11], 1 }
0x1469   :  { %1856 = vsyncpa [#allocation14], 1 }
0x146a   :  { %1857 = vsyncpa [#allocation17], 1 }
0x146b   :  { %1858 = vsyncpa [#allocation20], 1 }

</bundles_post_ra>
